<compile_context>
chip_gen: v6e
topology: v6e:2x2x1
jax: 0.10.0
libtpu: 0.0.40
codegen_flags: <defaults>
</compile_context>

<pallas_src>
import functools
import math

import jax
import jax.numpy as jnp
from jax import lax
from jax.experimental import pallas as pl
from jax.experimental.pallas import tpu as pltpu

LN_EPS = 1e-5


def _layernorm_f32(x, gamma, beta):
    x = x.astype(jnp.float32)
    mean = jnp.mean(x, axis=-1, keepdims=True)
    var = jnp.mean((x - mean) ** 2, axis=-1, keepdims=True)
    inv = lax.rsqrt(var + LN_EPS)
    return (x - mean) * inv * gamma + beta


def _gelu_exact(x):
    # nn.GELU() default = exact erf GELU
    return 0.5 * x * (1.0 + lax.erf(x * (1.0 / math.sqrt(2.0))))


def _split_heads(x2d, n_head, head_size):
    # (T, D) f32 -> (NH, T, hs) bf16.  Relayout in f32, cast after.
    t = x2d.shape[0]
    xh = jnp.transpose(x2d.reshape(t, n_head, head_size), (1, 0, 2))
    return xh.astype(jnp.bfloat16)


def gpt_block_kernel(
    x_q_ref, x_kv_ref,
    ln1_g_ref, ln1_b_ref,
    wq_ref, wk_ref, wv_ref,
    bq_ref, bk_ref, bv_ref,
    wout_ref, bout_ref,
    ln2_g_ref, ln2_b_ref,
    w1_ref, b1_ref,
    w2_ref, b2_ref,
    o_ref,
    q_scratch, m_scratch, l_scratch, acc_scratch,
    *, n_head: int, head_size: int, tq: int, tk: int,
):
    qi = pl.program_id(1)
    ki = pl.program_id(2)
    nk = pl.num_programs(2)

    # ---- first KV step: init online-softmax state, project + cache Q ----------
    @pl.when(ki == 0)
    def _():
        x_q = x_q_ref[0]                                               # (TQ, D) f32
        h_q = _layernorm_f32(x_q, ln1_g_ref[...], ln1_b_ref[...])
        # 1/sqrt(head_size) is already folded into wq / bq by the wrapper.
        q2d = jnp.dot(h_q.astype(jnp.bfloat16), wq_ref[...],
                      preferred_element_type=jnp.float32) + bq_ref[...]
        q_scratch[...] = _split_heads(q2d, n_head, head_size)          # (NH,TQ,hs) bf16
        m_scratch[...] = jnp.full(m_scratch.shape, -jnp.inf, dtype=jnp.float32)
        l_scratch[...] = jnp.zeros(l_scratch.shape, jnp.float32)
        acc_scratch[...] = jnp.zeros(acc_scratch.shape, jnp.float32)

    # ---- online-softmax update; skip fully-masked (causal) KV blocks ----------
    @pl.when(ki <= qi)                      # tq == tk, so ki > qi is fully masked
    def _():
        x_kv = x_kv_ref[0]                                             # (TK, D) f32
        h_kv = _layernorm_f32(x_kv, ln1_g_ref[...], ln1_b_ref[...])
        h_kv16 = h_kv.astype(jnp.bfloat16)
        k2d = jnp.dot(h_kv16, wk_ref[...],
                      preferred_element_type=jnp.float32) + bk_ref[...]
        v2d = jnp.dot(h_kv16, wv_ref[...],
                      preferred_element_type=jnp.float32) + bv_ref[...]
        kh = _split_heads(k2d, n_head, head_size)                      # (NH,TK,hs) bf16
        vh = _split_heads(v2d, n_head, head_size)                      # (NH,TK,hs) bf16

        # scores: batched over heads, contract hs of both operands (no K transpose)
        s = lax.dot_general(q_scratch[...], kh,
                            dimension_numbers=(((2,), (2,)), ((0,), (0,))),
                            preferred_element_type=jnp.float32)        # (NH,TQ,TK) f32

        rows = qi * tq + lax.broadcasted_iota(jnp.int32, (tq, tk), 0)
        cols = ki * tk + lax.broadcasted_iota(jnp.int32, (tq, tk), 1)
        s = jnp.where((rows >= cols)[None], s, jnp.float32(-1e30))

        m_prev = m_scratch[...]
        m_new = jnp.maximum(m_prev, jnp.max(s, axis=-1, keepdims=True))
        alpha = jnp.exp(m_prev - m_new)
        p = jnp.exp(s - m_new)
        l_scratch[...] = alpha * l_scratch[...] + jnp.sum(p, axis=-1, keepdims=True)
        pv = lax.dot_general(p.astype(jnp.bfloat16), vh,
                             dimension_numbers=(((2,), (1,)), ((0,), (0,))),
                             preferred_element_type=jnp.float32)       # (NH,TQ,hs)
        acc_scratch[...] = alpha * acc_scratch[...] + pv
        m_scratch[...] = m_new

    # ---- last KV step: output proj + residual + LN2 + MLP + residual ----------
    @pl.when(ki == nk - 1)
    def _():
        x_q = x_q_ref[0]                                               # (TQ, D) f32
        inv_l = pl.reciprocal(l_scratch[...], approx=True)
        y = (acc_scratch[...] * inv_l).astype(jnp.bfloat16)            # (NH,TQ,hs)
        # per-head output projection, accumulated over heads (no lane concat)
        attn_h = lax.dot_general(y, wout_ref[...],
                                 dimension_numbers=(((2,), (1,)), ((0,), (0,))),
                                 preferred_element_type=jnp.float32)   # (NH,TQ,D)
        attn = jnp.sum(attn_h, axis=0) + bout_ref[...]                 # (TQ, D)
        x1 = x_q + attn

        h2 = _layernorm_f32(x1, ln2_g_ref[...], ln2_b_ref[...])
        m1 = jnp.dot(h2.astype(jnp.bfloat16), w1_ref[...],
                     preferred_element_type=jnp.float32) + b1_ref[...]
        m1 = _gelu_exact(m1)
        m2 = jnp.dot(m1.astype(jnp.bfloat16), w2_ref[...],
                     preferred_element_type=jnp.float32) + b2_ref[...]
        o_ref[0] = (x1 + m2).astype(o_ref.dtype)


def _choose_tile(t, target=256):
    """Largest multiple of 8 that divides t and is <= target (or t itself)."""
    if t <= target:
        return t
    best = None
    for cand in range(8, target + 1, 8):
        if t % cand == 0:
            best = cand
    return best if best is not None else t


def gpt_block(x, params, n_head, *, tile_q=None):
    B, T, D = x.shape
    assert D % n_head == 0
    hs = D // n_head

    (ln1_g, ln1_b, wqkv_t, bqkv, wout_t, bout,
     ln2_g, ln2_b, w1_t, b1, w2_t, b2) = params

    # ---- pre-split / pre-scale / bf16-cast weights for the kernel ----
    scale = 1.0 / math.sqrt(hs)
    wq = (wqkv_t[:, 0 * D:1 * D] * scale).astype(jnp.bfloat16)   # (D, D)
    wk = wqkv_t[:, 1 * D:2 * D].astype(jnp.bfloat16)             # (D, D)
    wv = wqkv_t[:, 2 * D:3 * D].astype(jnp.bfloat16)             # (D, D)
    bq = (bqkv[:, 0 * D:1 * D] * scale).astype(jnp.float32)      # (1, D)
    bk = bqkv[:, 1 * D:2 * D].astype(jnp.float32)
    bv = bqkv[:, 2 * D:3 * D].astype(jnp.float32)
    wout_h = wout_t.reshape(n_head, hs, D).astype(jnp.bfloat16)  # (NH, hs, D)
    w1 = w1_t.astype(jnp.bfloat16)                               # (D, 4D)
    w2 = w2_t.astype(jnp.bfloat16)                               # (4D, D)

    tq = tile_q if tile_q is not None else _choose_tile(T)
    tk = tq
    assert T % tq == 0
    nq = T // tq
    nk = T // tk

    def const_spec(arr):
        ndim = arr.ndim
        return pl.BlockSpec(arr.shape, lambda *_: (0,) * ndim)

    grid_spec = pltpu.PrefetchScalarGridSpec(
        num_scalar_prefetch=0,
        grid=(B, nq, nk),
        in_specs=[
            # x, query-tile view
            pl.BlockSpec((1, tq, D), lambda b, qi, ki: (b, qi, 0)),
            # x, KV-tile view (clamped: fully-masked blocks reuse previous fetch)
            pl.BlockSpec((1, tk, D), lambda b, qi, ki: (b, jnp.minimum(ki, qi), 0)),
            const_spec(ln1_g), const_spec(ln1_b),
            const_spec(wq), const_spec(wk), const_spec(wv),
            const_spec(bq), const_spec(bk), const_spec(bv),
            const_spec(wout_h), const_spec(bout),
            const_spec(ln2_g), const_spec(ln2_b),
            const_spec(w1), const_spec(b1),
            const_spec(w2), const_spec(b2),
        ],
        out_specs=pl.BlockSpec((1, tq, D), lambda b, qi, ki: (b, qi, 0)),
        scratch_shapes=[
            pltpu.VMEM((n_head, tq, hs), jnp.bfloat16),   # cached Q (pre-scaled)
            pltpu.VMEM((n_head, tq, 1), jnp.float32),     # running max
            pltpu.VMEM((n_head, tq, 1), jnp.float32),     # running sum
            pltpu.VMEM((n_head, tq, hs), jnp.float32),    # PV accumulator
        ],
    )

    kernel = functools.partial(
        gpt_block_kernel, n_head=n_head, head_size=hs, tq=tq, tk=tk)

    return pl.pallas_call(
        kernel,
        out_shape=jax.ShapeDtypeStruct((B, T, D), jnp.float32),
        grid_spec=grid_spec,
        compiler_params=pltpu.CompilerParams(
            dimension_semantics=("parallel", "parallel", "arbitrary"),
            # Stays under v7x's 64 MiB physical VMEM while giving headroom for
            # resident weights + double-buffered activation tiles on v5e/v6e.
            vmem_limit_bytes=48 * 1024 * 1024,
        ),
    )(x, x, ln1_g, ln1_b, wq, wk, wv, bq, bk, bv,
      wout_h, bout, ln2_g, ln2_b, w1, b1, w2, b2)


# ----------------------------- parameters (torch-faithful init) -----------------------------

def xavier_uniform(key, out_features, in_features):
    bound = math.sqrt(6.0 / (in_features + out_features))
    # torch weight shape is (out, in); return transposed (in, out) for the kernel
    w = jax.random.uniform(key, (out_features, in_features),
                           dtype=jnp.float32, minval=-bound, maxval=bound)
    return w.T


def init_params(key, d_model):
    k1, k2, k3, k4 = jax.random.split(key, 4)
    ln1_g = jnp.ones((1, d_model), jnp.float32)
    ln1_b = jnp.zeros((1, d_model), jnp.float32)
    wqkv_t = xavier_uniform(k1, 3 * d_model, d_model)           # (D, 3D)
    bqkv = jnp.zeros((1, 3 * d_model), jnp.float32)
    wout_t = xavier_uniform(k2, d_model, d_model)               # (D, D)
    bout = jnp.zeros((1, d_model), jnp.float32)
    ln2_g = jnp.ones((1, d_model), jnp.float32)
    ln2_b = jnp.zeros((1, d_model), jnp.float32)
    w1_t = xavier_uniform(k3, 4 * d_model, d_model)             # (D, 4D)
    b1 = jnp.zeros((1, 4 * d_model), jnp.float32)
    w2_t = xavier_uniform(k4, d_model, 4 * d_model)             # (4D, D)
    b2 = jnp.zeros((1, d_model), jnp.float32)
    return (ln1_g, ln1_b, wqkv_t, bqkv, wout_t, bout,
            ln2_g, ln2_b, w1_t, b1, w2_t, b2)


# ----------------------------- pure-JAX reference (f32) -----------------------------

def gpt_block_reference(x, params, n_head):
    (ln1_g, ln1_b, wqkv_t, bqkv, wout_t, bout,
     ln2_g, ln2_b, w1_t, b1, w2_t, b2) = params
    B, T, D = x.shape
    hs = D // n_head

    def ln(v, g, b):
        mu = jnp.mean(v, -1, keepdims=True)
        var = jnp.mean((v - mu) ** 2, -1, keepdims=True)
        return (v - mu) * lax.rsqrt(var + LN_EPS) * g + b

    h = ln(x, ln1_g, ln1_b)
    qkv = h @ wqkv_t + bqkv
    q, k, v = jnp.split(qkv, 3, axis=-1)
    heads = lambda a: a.reshape(B, T, n_head, hs).transpose(0, 2, 1, 3)
    q, k, v = heads(q), heads(k), heads(v)
    s = jnp.einsum('bhqe,bhke->bhqk', q, k) / math.sqrt(hs)
    mask = jnp.tril(jnp.ones((T, T), bool))
    s = jnp.where(mask, s, -jnp.inf)
    p = jax.nn.softmax(s, axis=-1)
    y = jnp.einsum('bhqk,bhke->bhqe', p, v)
    y = y.transpose(0, 2, 1, 3).reshape(B, T, D)
    x1 = x + y @ wout_t + bout
    h2 = ln(x1, ln2_g, ln2_b)
    m = jax.nn.gelu(h2 @ w1_t + b1, approximate=False)
    return x1 + m @ w2_t + b2


if __name__ == "__main__":
    B, T, D, NH = 2, 8, 32, 4
    key = jax.random.PRNGKey(0)
    kx, kp = jax.random.split(key)
    x = jax.random.normal(kx, (B, T, D), dtype=jnp.float32)
    params = init_params(kp, D)

    out = gpt_block(x, params, NH)
    jax.block_until_ready(out)
    assert out.shape == (B, T, D) and out.dtype == jnp.float32
    assert bool(jnp.all(jnp.isfinite(out)))

    ref = gpt_block_reference(x, params, NH)
    err = float(jnp.max(jnp.abs(out - ref)))
    assert err < 0.2, f"kernel vs f32 reference max abs err {err}"  # bf16-matmul tolerance

    print("KERNEL_OK")
</pallas_src>

<mosaic_0001>
module attributes {stable_mosaic.version = 11 : i64} {
  func.func @gpt_block_kernel(%arg0: i32, %arg1: i32, %arg2: i32, %arg3: memref<1x8x32xf32, #tpu.memory_space<vmem>>, %arg4: memref<1x8x32xf32, #tpu.memory_space<vmem>>, %arg5: memref<1x32xf32, #tpu.memory_space<vmem>>, %arg6: memref<1x32xf32, #tpu.memory_space<vmem>>, %arg7: memref<32x32xbf16, #tpu.memory_space<vmem>>, %arg8: memref<32x32xbf16, #tpu.memory_space<vmem>>, %arg9: memref<32x32xbf16, #tpu.memory_space<vmem>>, %arg10: memref<1x32xf32, #tpu.memory_space<vmem>>, %arg11: memref<1x32xf32, #tpu.memory_space<vmem>>, %arg12: memref<1x32xf32, #tpu.memory_space<vmem>>, %arg13: memref<4x8x32xbf16, #tpu.memory_space<vmem>>, %arg14: memref<1x32xf32, #tpu.memory_space<vmem>>, %arg15: memref<1x32xf32, #tpu.memory_space<vmem>>, %arg16: memref<1x32xf32, #tpu.memory_space<vmem>>, %arg17: memref<32x128xbf16, #tpu.memory_space<vmem>>, %arg18: memref<1x128xf32, #tpu.memory_space<vmem>>, %arg19: memref<128x32xbf16, #tpu.memory_space<vmem>>, %arg20: memref<1x32xf32, #tpu.memory_space<vmem>>, %arg21: memref<1x8x32xf32, #tpu.memory_space<vmem>>, %arg22: memref<4x8x8xbf16, #tpu.memory_space<vmem>>, %arg23: memref<4x8x1xf32, #tpu.memory_space<vmem>>, %arg24: memref<4x8x1xf32, #tpu.memory_space<vmem>>, %arg25: memref<4x8x8xf32, #tpu.memory_space<vmem>>) attributes {dimension_semantics = [#tpu.dimension_semantics<parallel>, #tpu.dimension_semantics<parallel>, #tpu.dimension_semantics<arbitrary>], iteration_bounds = array<i64: 2, 1, 1>, scalar_prefetch = 0 : i64, scratch_operands = 4 : i64, tpu.core_type = #tpu.core_type<tc>, window_params = [{transform_indices = @transform_0, window_bounds = array<i64: 1, 8, 32>}, {transform_indices = @transform_1, window_bounds = array<i64: 1, 8, 32>}, {pipeline_mode = #tpu.pipeline_mode<synchronous>, transform_indices = @transform_2, window_bounds = array<i64: 1, 32>}, {pipeline_mode = #tpu.pipeline_mode<synchronous>, transform_indices = @transform_3, window_bounds = array<i64: 1, 32>}, {pipeline_mode = #tpu.pipeline_mode<synchronous>, transform_indices = @transform_4, window_bounds = array<i64: 32, 32>}, {pipeline_mode = #tpu.pipeline_mode<synchronous>, transform_indices = @transform_5, window_bounds = array<i64: 32, 32>}, {pipeline_mode = #tpu.pipeline_mode<synchronous>, transform_indices = @transform_6, window_bounds = array<i64: 32, 32>}, {pipeline_mode = #tpu.pipeline_mode<synchronous>, transform_indices = @transform_7, window_bounds = array<i64: 1, 32>}, {pipeline_mode = #tpu.pipeline_mode<synchronous>, transform_indices = @transform_8, window_bounds = array<i64: 1, 32>}, {pipeline_mode = #tpu.pipeline_mode<synchronous>, transform_indices = @transform_9, window_bounds = array<i64: 1, 32>}, {pipeline_mode = #tpu.pipeline_mode<synchronous>, transform_indices = @transform_10, window_bounds = array<i64: 4, 8, 32>}, {pipeline_mode = #tpu.pipeline_mode<synchronous>, transform_indices = @transform_11, window_bounds = array<i64: 1, 32>}, {pipeline_mode = #tpu.pipeline_mode<synchronous>, transform_indices = @transform_12, window_bounds = array<i64: 1, 32>}, {pipeline_mode = #tpu.pipeline_mode<synchronous>, transform_indices = @transform_13, window_bounds = array<i64: 1, 32>}, {pipeline_mode = #tpu.pipeline_mode<synchronous>, transform_indices = @transform_14, window_bounds = array<i64: 32, 128>}, {pipeline_mode = #tpu.pipeline_mode<synchronous>, transform_indices = @transform_15, window_bounds = array<i64: 1, 128>}, {pipeline_mode = #tpu.pipeline_mode<synchronous>, transform_indices = @transform_16, window_bounds = array<i64: 128, 32>}, {pipeline_mode = #tpu.pipeline_mode<synchronous>, transform_indices = @transform_17, window_bounds = array<i64: 1, 32>}, {transform_indices = @transform_18, window_bounds = array<i64: 1, 8, 32>}]} {
    %c0_i32 = arith.constant 0 : i32
    %0 = arith.cmpi eq, %arg2, %c0_i32 : i32
    %1 = arith.extui %0 : i1 to i32
    %c0_i32_0 = arith.constant 0 : i32
    %2 = arith.cmpi ne, %1, %c0_i32_0 : i32
    scf.if %2 {
      %c0 = arith.constant 0 : index
      %c0_4 = arith.constant 0 : index
      %c0_5 = arith.constant 0 : index
      %9 = vector.load %arg3[%c0, %c0_4, %c0_5] : memref<1x8x32xf32, #tpu.memory_space<vmem>>, vector<1x8x32xf32>
      %10 = vector.shape_cast %9 : vector<1x8x32xf32> to vector<8x32xf32>
      %c0_6 = arith.constant 0 : index
      %c0_7 = arith.constant 0 : index
      %11 = vector.load %arg5[%c0_6, %c0_7] : memref<1x32xf32, #tpu.memory_space<vmem>>, vector<1x32xf32>
      %c0_8 = arith.constant 0 : index
      %c0_9 = arith.constant 0 : index
      %12 = vector.load %arg6[%c0_8, %c0_9] : memref<1x32xf32, #tpu.memory_space<vmem>>, vector<1x32xf32>
      %cst = arith.constant dense<0.000000e+00> : vector<8xf32>
      %13 = vector.multi_reduction <add>, %10, %cst [1] : vector<8x32xf32> to vector<8xf32>
      %14 = vector.shape_cast %13 : vector<8xf32> to vector<8x1xf32>
      %cst_10 = arith.constant 3.200000e+01 : f32
      %15 = vector.broadcast %cst_10 : f32 to vector<8x1xf32>
      %16 = arith.divf %14, %15 : vector<8x1xf32>
      %17 = vector.broadcast %16 : vector<8x1xf32> to vector<8x32xf32>
      %18 = arith.subf %10, %17 : vector<8x32xf32>
      %19 = arith.mulf %18, %18 : vector<8x32xf32>
      %cst_11 = arith.constant dense<0.000000e+00> : vector<8xf32>
      %20 = vector.multi_reduction <add>, %19, %cst_11 [1] : vector<8x32xf32> to vector<8xf32>
      %21 = vector.shape_cast %20 : vector<8xf32> to vector<8x1xf32>
      %cst_12 = arith.constant 3.200000e+01 : f32
      %22 = vector.broadcast %cst_12 : f32 to vector<8x1xf32>
      %23 = arith.divf %21, %22 : vector<8x1xf32>
      %cst_13 = arith.constant 9.99999974E-6 : f32
      %24 = vector.broadcast %cst_13 : f32 to vector<8x1xf32>
      %25 = arith.addf %23, %24 : vector<8x1xf32>
      %26 = math.rsqrt %25 : vector<8x1xf32>
      %27 = vector.broadcast %16 : vector<8x1xf32> to vector<8x32xf32>
      %28 = arith.subf %10, %27 : vector<8x32xf32>
      %29 = vector.broadcast %26 : vector<8x1xf32> to vector<8x32xf32>
      %30 = arith.mulf %28, %29 : vector<8x32xf32>
      %31 = vector.broadcast %11 : vector<1x32xf32> to vector<8x32xf32>
      %32 = arith.mulf %30, %31 : vector<8x32xf32>
      %33 = vector.broadcast %12 : vector<1x32xf32> to vector<8x32xf32>
      %34 = arith.addf %32, %33 : vector<8x32xf32>
      %35 = arith.truncf %34 : vector<8x32xf32> to vector<8x32xbf16>
      %c0_14 = arith.constant 0 : index
      %c0_15 = arith.constant 0 : index
      %36 = vector.load %arg7[%c0_14, %c0_15] : memref<32x32xbf16, #tpu.memory_space<vmem>>, vector<32x32xbf16>
      %cst_16 = arith.constant dense<0.000000e+00> : vector<8x32xf32>
      %37 = tpu.matmul %35, %36, %cst_16 {dimension_numbers = #tpu.dot_dimension_numbers<[1], [0], [0], [1], [0, 0, 1, 1], [], []>} : vector<8x32xbf16>, vector<32x32xbf16>, vector<8x32xf32> -> vector<8x32xf32>
      %c0_17 = arith.constant 0 : index
      %c0_18 = arith.constant 0 : index
      %38 = vector.load %arg10[%c0_17, %c0_18] : memref<1x32xf32, #tpu.memory_space<vmem>>, vector<1x32xf32>
      %39 = vector.broadcast %38 : vector<1x32xf32> to vector<8x32xf32>
      %40 = arith.addf %37, %39 : vector<8x32xf32>
      %41 = vector.shape_cast %40 : vector<8x32xf32> to vector<8x4x8xf32>
      %42 = tpu.transpose %41, [1, 0, 2] : vector<8x4x8xf32> -> vector<4x8x8xf32>
      %43 = arith.truncf %42 : vector<4x8x8xf32> to vector<4x8x8xbf16>
      %c0_19 = arith.constant 0 : index
      %c0_20 = arith.constant 0 : index
      %c0_21 = arith.constant 0 : index
      %44 = vector.load %arg22[%c0_19, %c0_20, %c0_21] : memref<4x8x8xbf16, #tpu.memory_space<vmem>>, vector<4x8x8xbf16>
      tpu.vector_store %arg22[%c0_19, %c0_20, %c0_21], %43 {strides = array<i32>} : memref<4x8x8xbf16, #tpu.memory_space<vmem>>, vector<4x8x8xbf16>,
      %cst_22 = arith.constant 0xFF800000 : f32
      %45 = vector.broadcast %cst_22 : f32 to vector<4x8x1xf32>
      %c0_23 = arith.constant 0 : index
      %c0_24 = arith.constant 0 : index
      %c0_25 = arith.constant 0 : index
      %46 = vector.load %arg23[%c0_23, %c0_24, %c0_25] : memref<4x8x1xf32, #tpu.memory_space<vmem>>, vector<4x8x1xf32>
      tpu.vector_store %arg23[%c0_23, %c0_24, %c0_25], %45 {strides = array<i32>} : memref<4x8x1xf32, #tpu.memory_space<vmem>>, vector<4x8x1xf32>,
      %cst_26 = arith.constant 0.000000e+00 : f32
      %47 = vector.broadcast %cst_26 : f32 to vector<4x8x1xf32>
      %c0_27 = arith.constant 0 : index
      %c0_28 = arith.constant 0 : index
      %c0_29 = arith.constant 0 : index
      %48 = vector.load %arg24[%c0_27, %c0_28, %c0_29] : memref<4x8x1xf32, #tpu.memory_space<vmem>>, vector<4x8x1xf32>
      tpu.vector_store %arg24[%c0_27, %c0_28, %c0_29], %47 {strides = array<i32>} : memref<4x8x1xf32, #tpu.memory_space<vmem>>, vector<4x8x1xf32>,
      %cst_30 = arith.constant 0.000000e+00 : f32
      %49 = vector.broadcast %cst_30 : f32 to vector<4x8x8xf32>
      %c0_31 = arith.constant 0 : index
      %c0_32 = arith.constant 0 : index
      %c0_33 = arith.constant 0 : index
      %50 = vector.load %arg25[%c0_31, %c0_32, %c0_33] : memref<4x8x8xf32, #tpu.memory_space<vmem>>, vector<4x8x8xf32>
      tpu.vector_store %arg25[%c0_31, %c0_32, %c0_33], %49 {strides = array<i32>} : memref<4x8x8xf32, #tpu.memory_space<vmem>>, vector<4x8x8xf32>,
    } else {
    }
    %3 = arith.cmpi sle, %arg2, %arg1 : i32
    %4 = arith.extui %3 : i1 to i32
    %c0_i32_1 = arith.constant 0 : i32
    %5 = arith.cmpi ne, %4, %c0_i32_1 : i32
    scf.if %5 {
      %c0 = arith.constant 0 : index
      %c0_4 = arith.constant 0 : index
      %c0_5 = arith.constant 0 : index
      %9 = vector.load %arg4[%c0, %c0_4, %c0_5] : memref<1x8x32xf32, #tpu.memory_space<vmem>>, vector<1x8x32xf32>
      %10 = vector.shape_cast %9 : vector<1x8x32xf32> to vector<8x32xf32>
      %c0_6 = arith.constant 0 : index
      %c0_7 = arith.constant 0 : index
      %11 = vector.load %arg5[%c0_6, %c0_7] : memref<1x32xf32, #tpu.memory_space<vmem>>, vector<1x32xf32>
      %c0_8 = arith.constant 0 : index
      %c0_9 = arith.constant 0 : index
      %12 = vector.load %arg6[%c0_8, %c0_9] : memref<1x32xf32, #tpu.memory_space<vmem>>, vector<1x32xf32>
      %cst = arith.constant dense<0.000000e+00> : vector<8xf32>
      %13 = vector.multi_reduction <add>, %10, %cst [1] : vector<8x32xf32> to vector<8xf32>
      %14 = vector.shape_cast %13 : vector<8xf32> to vector<8x1xf32>
      %cst_10 = arith.constant 3.200000e+01 : f32
      %15 = vector.broadcast %cst_10 : f32 to vector<8x1xf32>
      %16 = arith.divf %14, %15 : vector<8x1xf32>
      %17 = vector.broadcast %16 : vector<8x1xf32> to vector<8x32xf32>
      %18 = arith.subf %10, %17 : vector<8x32xf32>
      %19 = arith.mulf %18, %18 : vector<8x32xf32>
      %cst_11 = arith.constant dense<0.000000e+00> : vector<8xf32>
      %20 = vector.multi_reduction <add>, %19, %cst_11 [1] : vector<8x32xf32> to vector<8xf32>
      %21 = vector.shape_cast %20 : vector<8xf32> to vector<8x1xf32>
      %cst_12 = arith.constant 3.200000e+01 : f32
      %22 = vector.broadcast %cst_12 : f32 to vector<8x1xf32>
      %23 = arith.divf %21, %22 : vector<8x1xf32>
      %cst_13 = arith.constant 9.99999974E-6 : f32
      %24 = vector.broadcast %cst_13 : f32 to vector<8x1xf32>
      %25 = arith.addf %23, %24 : vector<8x1xf32>
      %26 = math.rsqrt %25 : vector<8x1xf32>
      %27 = vector.broadcast %16 : vector<8x1xf32> to vector<8x32xf32>
      %28 = arith.subf %10, %27 : vector<8x32xf32>
      %29 = vector.broadcast %26 : vector<8x1xf32> to vector<8x32xf32>
      %30 = arith.mulf %28, %29 : vector<8x32xf32>
      %31 = vector.broadcast %11 : vector<1x32xf32> to vector<8x32xf32>
      %32 = arith.mulf %30, %31 : vector<8x32xf32>
      %33 = vector.broadcast %12 : vector<1x32xf32> to vector<8x32xf32>
      %34 = arith.addf %32, %33 : vector<8x32xf32>
      %35 = arith.truncf %34 : vector<8x32xf32> to vector<8x32xbf16>
      %c0_14 = arith.constant 0 : index
      %c0_15 = arith.constant 0 : index
      %36 = vector.load %arg8[%c0_14, %c0_15] : memref<32x32xbf16, #tpu.memory_space<vmem>>, vector<32x32xbf16>
      %cst_16 = arith.constant dense<0.000000e+00> : vector<8x32xf32>
      %37 = tpu.matmul %35, %36, %cst_16 {dimension_numbers = #tpu.dot_dimension_numbers<[1], [0], [0], [1], [0, 0, 1, 1], [], []>} : vector<8x32xbf16>, vector<32x32xbf16>, vector<8x32xf32> -> vector<8x32xf32>
      %c0_17 = arith.constant 0 : index
      %c0_18 = arith.constant 0 : index
      %38 = vector.load %arg11[%c0_17, %c0_18] : memref<1x32xf32, #tpu.memory_space<vmem>>, vector<1x32xf32>
      %39 = vector.broadcast %38 : vector<1x32xf32> to vector<8x32xf32>
      %40 = arith.addf %37, %39 : vector<8x32xf32>
      %c0_19 = arith.constant 0 : index
      %c0_20 = arith.constant 0 : index
      %41 = vector.load %arg9[%c0_19, %c0_20] : memref<32x32xbf16, #tpu.memory_space<vmem>>, vector<32x32xbf16>
      %cst_21 = arith.constant dense<0.000000e+00> : vector<8x32xf32>
      %42 = tpu.matmul %35, %41, %cst_21 {dimension_numbers = #tpu.dot_dimension_numbers<[1], [0], [0], [1], [0, 0, 1, 1], [], []>} : vector<8x32xbf16>, vector<32x32xbf16>, vector<8x32xf32> -> vector<8x32xf32>
      %c0_22 = arith.constant 0 : index
      %c0_23 = arith.constant 0 : index
      %43 = vector.load %arg12[%c0_22, %c0_23] : memref<1x32xf32, #tpu.memory_space<vmem>>, vector<1x32xf32>
      %44 = vector.broadcast %43 : vector<1x32xf32> to vector<8x32xf32>
      %45 = arith.addf %42, %44 : vector<8x32xf32>
      %46 = vector.shape_cast %40 : vector<8x32xf32> to vector<8x4x8xf32>
      %47 = tpu.transpose %46, [1, 0, 2] : vector<8x4x8xf32> -> vector<4x8x8xf32>
      %48 = arith.truncf %47 : vector<4x8x8xf32> to vector<4x8x8xbf16>
      %49 = vector.shape_cast %45 : vector<8x32xf32> to vector<8x4x8xf32>
      %50 = tpu.transpose %49, [1, 0, 2] : vector<8x4x8xf32> -> vector<4x8x8xf32>
      %51 = arith.truncf %50 : vector<4x8x8xf32> to vector<4x8x8xbf16>
      %c0_24 = arith.constant 0 : index
      %c0_25 = arith.constant 0 : index
      %c0_26 = arith.constant 0 : index
      %52 = vector.load %arg22[%c0_24, %c0_25, %c0_26] : memref<4x8x8xbf16, #tpu.memory_space<vmem>>, vector<4x8x8xbf16>
      %cst_27 = arith.constant dense<0.000000e+00> : vector<4x8x8xf32>
      %53 = tpu.matmul %52, %48, %cst_27 {dimension_numbers = #tpu.dot_dimension_numbers<[2], [2], [1], [1], [0, 0, 0, 1, 1, 1], [0], [0]>} : vector<4x8x8xbf16>, vector<4x8x8xbf16>, vector<4x8x8xf32> -> vector<4x8x8xf32>
      %c8_i32 = arith.constant 8 : i32
      %54 = arith.muli %arg1, %c8_i32 : i32
      %55 = tpu.iota {dimensions = array<i32: 0>} : vector<8x8xi32>
      %56 = vector.broadcast %54 : i32 to vector<8x8xi32>
      %57 = arith.addi %56, %55 : vector<8x8xi32>
      %c8_i32_28 = arith.constant 8 : i32
      %58 = arith.muli %arg2, %c8_i32_28 : i32
      %59 = tpu.iota {dimensions = array<i32: 1>} : vector<8x8xi32>
      %60 = vector.broadcast %58 : i32 to vector<8x8xi32>
      %61 = arith.addi %60, %59 : vector<8x8xi32>
      %62 = arith.cmpi sge, %57, %61 : vector<8x8xi32>
      %63 = vector.shape_cast %62 : vector<8x8xi1> to vector<1x8x8xi1>
      %cst_29 = arith.constant -1.000000e+30 : f32
      %64 = vector.shape_cast %63 : vector<1x8x8xi1> to vector<1x8x8xi1>
      %65 = vector.broadcast %64 : vector<1x8x8xi1> to vector<4x8x8xi1>
      %66 = vector.broadcast %cst_29 : f32 to vector<4x8x8xf32>
      %67 = arith.select %65, %53, %66 : vector<4x8x8xi1>, vector<4x8x8xf32>
      %c0_30 = arith.constant 0 : index
      %c0_31 = arith.constant 0 : index
      %c0_32 = arith.constant 0 : index
      %68 = vector.load %arg23[%c0_30, %c0_31, %c0_32] : memref<4x8x1xf32, #tpu.memory_space<vmem>>, vector<4x8x1xf32>
      %cst_33 = arith.constant dense<0xFF800000> : vector<4x8xf32>
      %69 = vector.multi_reduction <maximumf>, %67, %cst_33 [2] : vector<4x8x8xf32> to vector<4x8xf32>
      %70 = vector.shape_cast %69 : vector<4x8xf32> to vector<4x8x1xf32>
      %71 = arith.maximumf %68, %70 : vector<4x8x1xf32>
      %72 = arith.subf %68, %71 : vector<4x8x1xf32>
      %73 = math.exp %72 : vector<4x8x1xf32>
      %74 = vector.broadcast %71 : vector<4x8x1xf32> to vector<4x8x8xf32>
      %75 = arith.subf %67, %74 : vector<4x8x8xf32>
      %76 = math.exp %75 : vector<4x8x8xf32>
      %c0_34 = arith.constant 0 : index
      %c0_35 = arith.constant 0 : index
      %c0_36 = arith.constant 0 : index
      %77 = vector.load %arg24[%c0_34, %c0_35, %c0_36] : memref<4x8x1xf32, #tpu.memory_space<vmem>>, vector<4x8x1xf32>
      %78 = arith.mulf %73, %77 : vector<4x8x1xf32>
      %cst_37 = arith.constant dense<0.000000e+00> : vector<4x8xf32>
      %79 = vector.multi_reduction <add>, %76, %cst_37 [2] : vector<4x8x8xf32> to vector<4x8xf32>
      %80 = vector.shape_cast %79 : vector<4x8xf32> to vector<4x8x1xf32>
      %81 = arith.addf %78, %80 : vector<4x8x1xf32>
      %c0_38 = arith.constant 0 : index
      %c0_39 = arith.constant 0 : index
      %c0_40 = arith.constant 0 : index
      %82 = vector.load %arg24[%c0_38, %c0_39, %c0_40] : memref<4x8x1xf32, #tpu.memory_space<vmem>>, vector<4x8x1xf32>
      tpu.vector_store %arg24[%c0_38, %c0_39, %c0_40], %81 {strides = array<i32>} : memref<4x8x1xf32, #tpu.memory_space<vmem>>, vector<4x8x1xf32>,
      %83 = arith.truncf %76 : vector<4x8x8xf32> to vector<4x8x8xbf16>
      %cst_41 = arith.constant dense<0.000000e+00> : vector<4x8x8xf32>
      %84 = tpu.matmul %83, %51, %cst_41 {dimension_numbers = #tpu.dot_dimension_numbers<[2], [1], [1], [2], [0, 0, 0, 1, 1, 2], [0], [0]>} : vector<4x8x8xbf16>, vector<4x8x8xbf16>, vector<4x8x8xf32> -> vector<4x8x8xf32>
      %c0_42 = arith.constant 0 : index
      %c0_43 = arith.constant 0 : index
      %c0_44 = arith.constant 0 : index
      %85 = vector.load %arg25[%c0_42, %c0_43, %c0_44] : memref<4x8x8xf32, #tpu.memory_space<vmem>>, vector<4x8x8xf32>
      %86 = vector.broadcast %73 : vector<4x8x1xf32> to vector<4x8x8xf32>
      %87 = arith.mulf %86, %85 : vector<4x8x8xf32>
      %88 = arith.addf %87, %84 : vector<4x8x8xf32>
      %c0_45 = arith.constant 0 : index
      %c0_46 = arith.constant 0 : index
      %c0_47 = arith.constant 0 : index
      %89 = vector.load %arg25[%c0_45, %c0_46, %c0_47] : memref<4x8x8xf32, #tpu.memory_space<vmem>>, vector<4x8x8xf32>
      tpu.vector_store %arg25[%c0_45, %c0_46, %c0_47], %88 {strides = array<i32>} : memref<4x8x8xf32, #tpu.memory_space<vmem>>, vector<4x8x8xf32>,
      %c0_48 = arith.constant 0 : index
      %c0_49 = arith.constant 0 : index
      %c0_50 = arith.constant 0 : index
      %90 = vector.load %arg23[%c0_48, %c0_49, %c0_50] : memref<4x8x1xf32, #tpu.memory_space<vmem>>, vector<4x8x1xf32>
      tpu.vector_store %arg23[%c0_48, %c0_49, %c0_50], %71 {strides = array<i32>} : memref<4x8x1xf32, #tpu.memory_space<vmem>>, vector<4x8x1xf32>,
    } else {
    }
    %c0_i32_2 = arith.constant 0 : i32
    %6 = arith.cmpi eq, %arg2, %c0_i32_2 : i32
    %7 = arith.extui %6 : i1 to i32
    %c0_i32_3 = arith.constant 0 : i32
    %8 = arith.cmpi ne, %7, %c0_i32_3 : i32
    scf.if %8 {
      %c0 = arith.constant 0 : index
      %c0_4 = arith.constant 0 : index
      %c0_5 = arith.constant 0 : index
      %9 = vector.load %arg3[%c0, %c0_4, %c0_5] : memref<1x8x32xf32, #tpu.memory_space<vmem>>, vector<1x8x32xf32>
      %10 = vector.shape_cast %9 : vector<1x8x32xf32> to vector<8x32xf32>
      %c0_6 = arith.constant 0 : index
      %c0_7 = arith.constant 0 : index
      %c0_8 = arith.constant 0 : index
      %11 = vector.load %arg24[%c0_6, %c0_7, %c0_8] : memref<4x8x1xf32, #tpu.memory_space<vmem>>, vector<4x8x1xf32>
      %12 = tpu.reciprocal %11 {approx = true} : vector<4x8x1xf32> -> vector<4x8x1xf32>
      %c0_9 = arith.constant 0 : index
      %c0_10 = arith.constant 0 : index
      %c0_11 = arith.constant 0 : index
      %13 = vector.load %arg25[%c0_9, %c0_10, %c0_11] : memref<4x8x8xf32, #tpu.memory_space<vmem>>, vector<4x8x8xf32>
      %14 = vector.broadcast %12 : vector<4x8x1xf32> to vector<4x8x8xf32>
      %15 = arith.mulf %13, %14 : vector<4x8x8xf32>
      %16 = arith.truncf %15 : vector<4x8x8xf32> to vector<4x8x8xbf16>
      %c0_12 = arith.constant 0 : index
      %c0_13 = arith.constant 0 : index
      %c0_14 = arith.constant 0 : index
      %17 = vector.load %arg13[%c0_12, %c0_13, %c0_14] : memref<4x8x32xbf16, #tpu.memory_space<vmem>>, vector<4x8x32xbf16>
      %cst = arith.constant dense<0.000000e+00> : vector<4x8x32xf32>
      %18 = tpu.matmul %16, %17, %cst {dimension_numbers = #tpu.dot_dimension_numbers<[2], [1], [1], [2], [0, 0, 0, 1, 1, 2], [0], [0]>} : vector<4x8x8xbf16>, vector<4x8x32xbf16>, vector<4x8x32xf32> -> vector<4x8x32xf32>
      %cst_15 = arith.constant dense<0.000000e+00> : vector<8x32xf32>
      %19 = vector.multi_reduction <add>, %18, %cst_15 [0] : vector<4x8x32xf32> to vector<8x32xf32>
      %c0_16 = arith.constant 0 : index
      %c0_17 = arith.constant 0 : index
      %20 = vector.load %arg14[%c0_16, %c0_17] : memref<1x32xf32, #tpu.memory_space<vmem>>, vector<1x32xf32>
      %21 = vector.broadcast %20 : vector<1x32xf32> to vector<8x32xf32>
      %22 = arith.addf %19, %21 : vector<8x32xf32>
      %23 = arith.addf %10, %22 : vector<8x32xf32>
      %c0_18 = arith.constant 0 : index
      %c0_19 = arith.constant 0 : index
      %24 = vector.load %arg15[%c0_18, %c0_19] : memref<1x32xf32, #tpu.memory_space<vmem>>, vector<1x32xf32>
      %c0_20 = arith.constant 0 : index
      %c0_21 = arith.constant 0 : index
      %25 = vector.load %arg16[%c0_20, %c0_21] : memref<1x32xf32, #tpu.memory_space<vmem>>, vector<1x32xf32>
      %cst_22 = arith.constant dense<0.000000e+00> : vector<8xf32>
      %26 = vector.multi_reduction <add>, %23, %cst_22 [1] : vector<8x32xf32> to vector<8xf32>
      %27 = vector.shape_cast %26 : vector<8xf32> to vector<8x1xf32>
      %cst_23 = arith.constant 3.200000e+01 : f32
      %28 = vector.broadcast %cst_23 : f32 to vector<8x1xf32>
      %29 = arith.divf %27, %28 : vector<8x1xf32>
      %30 = vector.broadcast %29 : vector<8x1xf32> to vector<8x32xf32>
      %31 = arith.subf %23, %30 : vector<8x32xf32>
      %32 = arith.mulf %31, %31 : vector<8x32xf32>
      %cst_24 = arith.constant dense<0.000000e+00> : vector<8xf32>
      %33 = vector.multi_reduction <add>, %32, %cst_24 [1] : vector<8x32xf32> to vector<8xf32>
      %34 = vector.shape_cast %33 : vector<8xf32> to vector<8x1xf32>
      %cst_25 = arith.constant 3.200000e+01 : f32
      %35 = vector.broadcast %cst_25 : f32 to vector<8x1xf32>
      %36 = arith.divf %34, %35 : vector<8x1xf32>
      %cst_26 = arith.constant 9.99999974E-6 : f32
      %37 = vector.broadcast %cst_26 : f32 to vector<8x1xf32>
      %38 = arith.addf %36, %37 : vector<8x1xf32>
      %39 = math.rsqrt %38 : vector<8x1xf32>
      %40 = vector.broadcast %29 : vector<8x1xf32> to vector<8x32xf32>
      %41 = arith.subf %23, %40 : vector<8x32xf32>
      %42 = vector.broadcast %39 : vector<8x1xf32> to vector<8x32xf32>
      %43 = arith.mulf %41, %42 : vector<8x32xf32>
      %44 = vector.broadcast %24 : vector<1x32xf32> to vector<8x32xf32>
      %45 = arith.mulf %43, %44 : vector<8x32xf32>
      %46 = vector.broadcast %25 : vector<1x32xf32> to vector<8x32xf32>
      %47 = arith.addf %45, %46 : vector<8x32xf32>
      %48 = arith.truncf %47 : vector<8x32xf32> to vector<8x32xbf16>
      %c0_27 = arith.constant 0 : index
      %c0_28 = arith.constant 0 : index
      %49 = vector.load %arg17[%c0_27, %c0_28] : memref<32x128xbf16, #tpu.memory_space<vmem>>, vector<32x128xbf16>
      %cst_29 = arith.constant dense<0.000000e+00> : vector<8x128xf32>
      %50 = tpu.matmul %48, %49, %cst_29 {dimension_numbers = #tpu.dot_dimension_numbers<[1], [0], [0], [1], [0, 0, 1, 1], [], []>} : vector<8x32xbf16>, vector<32x128xbf16>, vector<8x128xf32> -> vector<8x128xf32>
      %c0_30 = arith.constant 0 : index
      %c0_31 = arith.constant 0 : index
      %51 = vector.load %arg18[%c0_30, %c0_31] : memref<1x128xf32, #tpu.memory_space<vmem>>, vector<1x128xf32>
      %52 = vector.broadcast %51 : vector<1x128xf32> to vector<8x128xf32>
      %53 = arith.addf %50, %52 : vector<8x128xf32>
      %cst_32 = arith.constant 5.000000e-01 : f32
      %54 = vector.broadcast %cst_32 : f32 to vector<8x128xf32>
      %55 = arith.mulf %54, %53 : vector<8x128xf32>
      %cst_33 = arith.constant 0.707106769 : f32
      %56 = vector.broadcast %cst_33 : f32 to vector<8x128xf32>
      %57 = arith.mulf %53, %56 : vector<8x128xf32>
      %58 = math.erf %57 : vector<8x128xf32>
      %cst_34 = arith.constant 1.000000e+00 : f32
      %59 = vector.broadcast %cst_34 : f32 to vector<8x128xf32>
      %60 = arith.addf %59, %58 : vector<8x128xf32>
      %61 = arith.mulf %55, %60 : vector<8x128xf32>
      %62 = arith.truncf %61 : vector<8x128xf32> to vector<8x128xbf16>
      %c0_35 = arith.constant 0 : index
      %c0_36 = arith.constant 0 : index
      %63 = vector.load %arg19[%c0_35, %c0_36] : memref<128x32xbf16, #tpu.memory_space<vmem>>, vector<128x32xbf16>
      %cst_37 = arith.constant dense<0.000000e+00> : vector<8x32xf32>
      %64 = tpu.matmul %62, %63, %cst_37 {dimension_numbers = #tpu.dot_dimension_numbers<[1], [0], [0], [1], [0, 0, 1, 1], [], []>} : vector<8x128xbf16>, vector<128x32xbf16>, vector<8x32xf32> -> vector<8x32xf32>
      %c0_38 = arith.constant 0 : index
      %c0_39 = arith.constant 0 : index
      %65 = vector.load %arg20[%c0_38, %c0_39] : memref<1x32xf32, #tpu.memory_space<vmem>>, vector<1x32xf32>
      %66 = vector.broadcast %65 : vector<1x32xf32> to vector<8x32xf32>
      %67 = arith.addf %64, %66 : vector<8x32xf32>
      %68 = arith.addf %23, %67 : vector<8x32xf32>
      %c0_40 = arith.constant 0 : index
      %c0_41 = arith.constant 0 : index
      %c0_42 = arith.constant 0 : index
      %69 = vector.load %arg21[%c0_40, %c0_41, %c0_42] : memref<1x8x32xf32, #tpu.memory_space<vmem>>, vector<1x8x32xf32>
      %70 = vector.shape_cast %69 : vector<1x8x32xf32> to vector<8x32xf32>
      %71 = vector.shape_cast %68 : vector<8x32xf32> to vector<1x8x32xf32>
      tpu.vector_store %arg21[%c0_40, %c0_41, %c0_42], %71 {strides = array<i32>} : memref<1x8x32xf32, #tpu.memory_space<vmem>>, vector<1x8x32xf32>,
    } else {
    }
    return
  }
  func.func @transform_0(%arg0: i32, %arg1: i32, %arg2: i32) -> (i32, i32, i32) {
    %c0_i32 = arith.constant 0 : i32
    %c0_i32_0 = arith.constant 0 : i32
    return %arg0, %arg1, %c0_i32 : i32, i32, i32
  }
  func.func @transform_1(%arg0: i32, %arg1: i32, %arg2: i32) -> (i32, i32, i32) {
    %0 = arith.minsi %arg2, %arg1 : i32
    %c0_i32 = arith.constant 0 : i32
    %c0_i32_0 = arith.constant 0 : i32
    return %arg0, %0, %c0_i32 : i32, i32, i32
  }
  func.func @transform_2(%arg0: i32, %arg1: i32, %arg2: i32) -> (i32, i32) {
    %c0_i32 = arith.constant 0 : i32
    %c0_i32_0 = arith.constant 0 : i32
    %c0_i32_1 = arith.constant 0 : i32
    return %c0_i32, %c0_i32_0 : i32, i32
  }
  func.func @transform_3(%arg0: i32, %arg1: i32, %arg2: i32) -> (i32, i32) {
    %c0_i32 = arith.constant 0 : i32
    %c0_i32_0 = arith.constant 0 : i32
    %c0_i32_1 = arith.constant 0 : i32
    return %c0_i32, %c0_i32_0 : i32, i32
  }
  func.func @transform_4(%arg0: i32, %arg1: i32, %arg2: i32) -> (i32, i32) {
    %c0_i32 = arith.constant 0 : i32
    %c0_i32_0 = arith.constant 0 : i32
    %c0_i32_1 = arith.constant 0 : i32
    return %c0_i32, %c0_i32_0 : i32, i32
  }
  func.func @transform_5(%arg0: i32, %arg1: i32, %arg2: i32) -> (i32, i32) {
    %c0_i32 = arith.constant 0 : i32
    %c0_i32_0 = arith.constant 0 : i32
    %c0_i32_1 = arith.constant 0 : i32
    return %c0_i32, %c0_i32_0 : i32, i32
  }
  func.func @transform_6(%arg0: i32, %arg1: i32, %arg2: i32) -> (i32, i32) {
    %c0_i32 = arith.constant 0 : i32
    %c0_i32_0 = arith.constant 0 : i32
    %c0_i32_1 = arith.constant 0 : i32
    return %c0_i32, %c0_i32_0 : i32, i32
  }
  func.func @transform_7(%arg0: i32, %arg1: i32, %arg2: i32) -> (i32, i32) {
    %c0_i32 = arith.constant 0 : i32
    %c0_i32_0 = arith.constant 0 : i32
    %c0_i32_1 = arith.constant 0 : i32
    return %c0_i32, %c0_i32_0 : i32, i32
  }
  func.func @transform_8(%arg0: i32, %arg1: i32, %arg2: i32) -> (i32, i32) {
    %c0_i32 = arith.constant 0 : i32
    %c0_i32_0 = arith.constant 0 : i32
    %c0_i32_1 = arith.constant 0 : i32
    return %c0_i32, %c0_i32_0 : i32, i32
  }
  func.func @transform_9(%arg0: i32, %arg1: i32, %arg2: i32) -> (i32, i32) {
    %c0_i32 = arith.constant 0 : i32
    %c0_i32_0 = arith.constant 0 : i32
    %c0_i32_1 = arith.constant 0 : i32
    return %c0_i32, %c0_i32_0 : i32, i32
  }
  func.func @transform_10(%arg0: i32, %arg1: i32, %arg2: i32) -> (i32, i32, i32) {
    %c0_i32 = arith.constant 0 : i32
    %c0_i32_0 = arith.constant 0 : i32
    %c0_i32_1 = arith.constant 0 : i32
    %c0_i32_2 = arith.constant 0 : i32
    return %c0_i32, %c0_i32_0, %c0_i32_1 : i32, i32, i32
  }
  func.func @transform_11(%arg0: i32, %arg1: i32, %arg2: i32) -> (i32, i32) {
    %c0_i32 = arith.constant 0 : i32
    %c0_i32_0 = arith.constant 0 : i32
    %c0_i32_1 = arith.constant 0 : i32
    return %c0_i32, %c0_i32_0 : i32, i32
  }
  func.func @transform_12(%arg0: i32, %arg1: i32, %arg2: i32) -> (i32, i32) {
    %c0_i32 = arith.constant 0 : i32
    %c0_i32_0 = arith.constant 0 : i32
    %c0_i32_1 = arith.constant 0 : i32
    return %c0_i32, %c0_i32_0 : i32, i32
  }
  func.func @transform_13(%arg0: i32, %arg1: i32, %arg2: i32) -> (i32, i32) {
    %c0_i32 = arith.constant 0 : i32
    %c0_i32_0 = arith.constant 0 : i32
    %c0_i32_1 = arith.constant 0 : i32
    return %c0_i32, %c0_i32_0 : i32, i32
  }
  func.func @transform_14(%arg0: i32, %arg1: i32, %arg2: i32) -> (i32, i32) {
    %c0_i32 = arith.constant 0 : i32
    %c0_i32_0 = arith.constant 0 : i32
    %c0_i32_1 = arith.constant 0 : i32
    return %c0_i32, %c0_i32_0 : i32, i32
  }
  func.func @transform_15(%arg0: i32, %arg1: i32, %arg2: i32) -> (i32, i32) {
    %c0_i32 = arith.constant 0 : i32
    %c0_i32_0 = arith.constant 0 : i32
    %c0_i32_1 = arith.constant 0 : i32
    return %c0_i32, %c0_i32_0 : i32, i32
  }
  func.func @transform_16(%arg0: i32, %arg1: i32, %arg2: i32) -> (i32, i32) {
    %c0_i32 = arith.constant 0 : i32
    %c0_i32_0 = arith.constant 0 : i32
    %c0_i32_1 = arith.constant 0 : i32
    return %c0_i32, %c0_i32_0 : i32, i32
  }
  func.func @transform_17(%arg0: i32, %arg1: i32, %arg2: i32) -> (i32, i32) {
    %c0_i32 = arith.constant 0 : i32
    %c0_i32_0 = arith.constant 0 : i32
    %c0_i32_1 = arith.constant 0 : i32
    return %c0_i32, %c0_i32_0 : i32, i32
  }
  func.func @transform_18(%arg0: i32, %arg1: i32, %arg2: i32) -> (i32, i32, i32) {
    %c0_i32 = arith.constant 0 : i32
    %c0_i32_0 = arith.constant 0 : i32
    return %arg0, %arg1, %c0_i32 : i32, i32, i32
  }
}

</mosaic_0001>

<bundles_post_ra>
// kernel: tpu_custom_call.1
= control target key start
LH: loop header
LB: loop body
LE: loop exit
PB: predicated region body
PF: predicated region fallthrough
CT: control target
= control target key end

     0   :  { %s3689_s0 = inlined_call_operand.vmem [shape: f32[2,8,32], index: 0, kind: input, shape index: {}]   ;;  %s3690_s1 = inlined_call_operand.vmem [shape: f32[2,8,32], index: 1, kind: input, shape index: {}]   ;;  %s3691_s2 = inlined_call_operand.vmem [shape: f32[1,32], index: 2, kind: input, shape index: {}]   ;;  %s3692_s3 = inlined_call_operand.vmem [shape: f32[1,32], index: 3, kind: input, shape index: {}]   ;;  %s3693_s4 = inlined_call_operand.vmem [shape: bf16[32,32], index: 4, kind: input, shape index: {}]   ;;  %s3694_s5 = inlined_call_operand.vmem [shape: bf16[32,32], index: 5, kind: input, shape index: {}]   ;;  %s3695_s6 = inlined_call_operand.vmem [shape: bf16[32,32], index: 6, kind: input, shape index: {}]   ;;  %s3696_s7 = inlined_call_operand.vmem [shape: f32[1,32], index: 7, kind: input, shape index: {}]   ;;  %s3697_s8 = inlined_call_operand.vmem [shape: f32[1,32], index: 8, kind: input, shape index: {}]   ;;  %s3698_s9 = inlined_call_operand.vmem [shape: f32[1,32], index: 9, kind: input, shape index: {}]   ;;  %s3699_s10 = inlined_call_operand.hbm [shape: bf16[4,8,32], index: 10, kind: input, shape index: {}]   ;;  %s3700_s11 = inlined_call_operand.vmem [shape: f32[1,32], index: 11, kind: input, shape index: {}]   ;;  %s3701_s12 = inlined_call_operand.vmem [shape: f32[1,32], index: 12, kind: input, shape index: {}]   ;;  %s3702_s13 = inlined_call_operand.vmem [shape: f32[1,32], index: 13, kind: input, shape index: {}]   ;;  %s3703_s14 = inlined_call_operand.hbm [shape: bf16[32,128], index: 14, kind: input, shape index: {}]   ;;  %s3704_s15 = inlined_call_operand.vmem [shape: f32[1,128], index: 15, kind: input, shape index: {}]   ;;  %s3705_s16 = inlined_call_operand.vmem [shape: bf16[128,32], index: 16, kind: input, shape index: {}]   ;;  %s3706_s17 = inlined_call_operand.vmem [shape: f32[1,32], index: 17, kind: input, shape index: {}]   ;;  %s3707_s18 = inlined_call_operand.hbm [shape: f32[2,8,32], index: 18, kind: output, shape index: {}]  }
   0x1   :  { %3716 = sst [smem:[#allocation22_spill]] %s3689_s0 }
   0x2   :  { %3717 = sst [smem:[#allocation23_spill]] %s3690_s1 }
   0x3   :  { %3718 = sst [smem:[#allocation24_spill]] %s3691_s2 }
   0x4   :  { %23 = vsyncpa [#allocation7], 0 }
   0x5   :  { %24 = vsyncpa [#allocation10], 0 }
   0x6   :  { %25 = vsyncpa [#allocation8], 0 }
   0x7   :  { %27 = vsyncpa [#allocation8 + $0x1], 0  ;;  %s3155_s27 = smov 0   ;;  %s3157_s28 = smov 0  }
   0x8   :  { %s3159_s29 = smov 0   ;;  %s3161_s30 = smov 0  }
   0x9   :  { %s3163_s0 = smov 0   ;;  %s3165_s19 = smov 0  }
   0xa LB: > { %3719 = sst [smem:[#allocation15_spill]] %s3024_s27  ;;  %s2535_s1 = sadd.s32 4294967295, %s3044_s19   ;;  %s3044_s19 = sphi %s3165_s19, %s33_s19   ;;  %s3040_s0 = sphi %s3163_s0, %s3742_s0   ;;  %s3036_s30 = sphi %s3161_s30, %s3741_s30   ;;  %s3032_s29 = sphi %s3159_s29, %s3740_s29   ;;  %s3028_s28 = sphi %s3157_s28, %s3744_s28   ;;  %s3024_s27 = sphi %s3155_s27, %s3743_s27  }
   0xb   : > { %3720 = sst [smem:[#allocation16_spill]] %s3032_s29  ;;  %s2536_s20 = sadd.s32 4294967294, %s3044_s19  }
   0xc   : > { %3721 = sst [smem:[#allocation17_spill]] %s3040_s0  ;;  %s52_s21 = sadd.s32 1, %s3040_s0 }
   0xd   : > { %3722 = sst [smem:[#allocation18_spill]] %s3044_s19  ;;  %s457_s22 = sadd.s32 1, %s3032_s29 }
   0xe   : > { %p54_p0 = scmp.ge.s32.totalorder %s52_s21, 2  ;;  %p467_p1 = scmp.ne.s32.totalorder %s3032_s29, %s3028_s28 }
   0xf   : > { %p468_p2 = scmp.eq.s32.totalorder %s2535_s1, 1  ;;  %p473_p3 = scmp.ne.s32.totalorder %s3028_s28, %s3024_s27 }
  0x10   : > { %s3746_s21 = smov (%p54_p0, %s52_s21), 0  ;;  %p474_p5 = scmp.eq.s32.totalorder %s2536_s20, 1 }
  0x11   : > { %3723 = sst [smem:[#allocation19_spill]] %s3746_s21  ;;  %p3195_p4 = por %p468_p2, %p467_p1 }
  0x12   : > { %s452_s23 = ssub.s32 %s3040_s0, %s3746_s21  ;;  %p2537_p6 = scmp.ge.s32.totalorder %s3044_s19, 1 }
  0x13   : > { %s3724_s2 = scalar_select %p3195_p4, 1, 0 }
  0x14   : > { %p455_p7 = scmp.eq.s32.totalorder %s452_s23, 0  ;;  %p3202_p8 = por %p474_p5, %p473_p3 }
  0x15   : > { %p481_p9 = scmp.lt.s32.totalorder %s3044_s19, 3  ;;  %p3214_p11 = scmp.eq.s32.totalorder %s2535_s1, 0 }
  0x16   : > { %s3725_s24 = scalar_select %p3202_p8, 1, 0 }
  0x17   : > { %s3208_s25 = scalar_select %p455_p7, %s3032_s29, %s457_s22  }
  0x18   : > { %3726 = sst [smem:[#allocation20_spill]] %s3725_s24  ;;  %p3210_p10 = pnand %p2537_p6, %p481_p9 }
  0x19   : > { %3727 = sst [smem:[#allocation21_spill]] %s3208_s25  ;;  %s3046_s20 = smov [#allocation6]  }
  0x1a   : > { %p2780_p12 = pneg %p3210_p10  ;;  %s517_s23 = sshll.u32 %s3046_s20, 4  ;;  %s518_s23 = int_to_ptr.vmem [resolvable:$true] %s517_s23 }
  0x1b   : > { %s3047_s22 = smov [#allocation9]   ;;  %s2919_s1 = scalar_lea.vmem %s518_s23, 256 }
  0x1c   : > { %p3222_p13 = pnand %p3214_p11, %p2780_p12  ;;  %s539_s0 = sshll.u32 %s3047_s22, 4  ;;  %s540_s0 = int_to_ptr.vmem [resolvable:$true] %s539_s0 }
  0x1d   : > { %p2920_p1 = scmp.ne.s32.totalorder %s518_s23, %s2919_s1  ;;  %p2927_p5 = scmp.lt.s32.totalorder %s518_s23, %s518_s23 }
  0x1e   : > { %p2910_p0 = pneg %p3222_p13  ;;  %p2928_p6 = scmp.lt.s32.totalorder %s2919_s1, %s2919_s1 }
  0x20   : > { %p2922_p2 = pnand %p2920_p1, %p2910_p0  ;;  %p2929_p7 = por %p2928_p6, %p2927_p5 }
  0x22   : > { %p2923_p3 = pneg %p2922_p2 }
  0x24   : > { %p2930_p9 = pnand %p2929_p7, %p2923_p3 }
  0x26   : > { %2933 = shalt.err (!%p2930_p9)
}
  0x27   : > { %s3048_s20 = smov 64   ;;  %s3049_s25 = smov 4  }
  0x28   : > { %2783 = dma.hbm_to_vmem [thread:$0]  (!%p3222_p13), %s3699_s10, 256, %s518_s23, [#allocation7], %s3048_s20, %s3048_s20, %s3049_s25  }
  0x29   : > { %s2945_s24 = scalar_lea.vmem %s540_s0, 256  ;;  %p2953_p8 = scmp.lt.s32.totalorder %s540_s0, %s540_s0 }
  0x2a   : > { %p2946_p12 = scmp.ne.s32.totalorder %s540_s0, %s2945_s24  ;;  %p2954_p4 = scmp.lt.s32.totalorder %s2945_s24, %s2945_s24 }
  0x2c   : > { %p2948_p1 = pnand %p2946_p12, %p2910_p0  ;;  %p2955_p5 = por %p2954_p4, %p2953_p8 }
  0x2e   : > { %p2949_p2 = pneg %p2948_p1 }
  0x30   : > { %p2956_p3 = pnand %p2955_p5, %p2949_p2 }
  0x32   : > { %2959 = shalt.err (!%p2956_p3)
}
  0x33   : > { %2786 = dma.hbm_to_vmem [thread:$0]  (!%p3222_p13), %s3703_s14, 256, %s540_s0, [#allocation10], %s3048_s20, %s3048_s20, %s3049_s25  }
  0x34   : > { %588 = sbr.rel (%p3210_p10) target bundleno = 2447 (0x98f), region = 92 }
  0x39   : > { %3011 = dma.done.wait (%p3214_p11), [#allocation7], 256  }
  0x3a   : > { %3013 = vsyncadd (%p3214_p11), [#allocation7], 4294967040 }
  0x3b   : > { %3015 = dma.done.wait (%p3214_p11), [#allocation10], 256  }
  0x3c   : > { %3017 = vsyncadd (%p3214_p11), [#allocation10], 4294967040  ;;  %p657_p4 = scmp.lt.s32.totalorder %s3036_s30, 1  ;;  %s3731_s24 = sld [smem:[#allocation22_spill]]  ;;  %vm683_vm0 = vcmask 261120   ;;  %v2859_v14 = vld [vmem:[%s3693_s4 + $0x8] sm:$0xff]   ;;  %v794_v57 = vlaneseq }
  0x3d   : > { %s3732_s20 = sld [smem:[#allocation23_spill]]  ;;  %v3050_v15 = vmov 0.0   ;;  %v2860_v16 = vld [vmem:[%s3693_s4] sm:$0xff]   ;;  %vm3051_vm1 = vmmov 0   ;;  %v2861_v31 = vld [vmem:[%s3694_s5 + $0x8] sm:$0xff]   ;;  %s3052_s23 = smov 120  }
  0x3e   : > { %s658_s29 = scalar_select %p657_p4, %s3036_s30, 1  ;;  %2646 = vmatprep.subr.bf16.mxu1 %v3050_v15  ;;  %2676 = vmatprep.subr.bf16.mxu0 %v3050_v15  ;;  %v2548_v26 = vld [vmem:[%s3692_s3] ss:$0 sm:$0xff]  ;;  %v2863_v36 = vld [vmem:[%s3695_s6 + $0x8] sm:$0xff]   ;;  %vm943_vm2 = vcmask 64512   ;;  %v3342_v61 = vshrl.u32 %v794_v57, 7 }
  0x3f   : > { %2647 = vmatpush3.bf16.msra.mxu1 %v2859_v14  ;;  %2650 = vmatprep.mubr.msk.bf16.mxu1 %vm3051_vm1, %v3050_v15  ;;  %v2862_v34 = vld [vmem:[%s3694_s5] sm:$0xff]   ;;  %s3054_s1 = smov 104   ;;  %944 = vst.msk [vmem:[#allocation5] sm:$0xff] %vm943_vm2, %v3050_v15  ;;  %945 = vst.msk [vmem:[#allocation5 + $0x8] sm:$0xff] %vm943_vm2, %v3050_v15  ;;  %v3055_v55 = vmov 1983009808  }
  0x40   : > { %s2545_s0 = sshll.u32 %s658_s29, 3  ;;  %2648 = vmatprep.subr.bf16.mxu1 %v3050_v15  ;;  %2678 = vmatprep.mubr.msk.bf16.mxu0 %vm3051_vm1, %v3050_v15  ;;  %v2864_v38 = vld [vmem:[%s3695_s6] sm:$0xff]   ;;  %946 = vst.msk [vmem:[#allocation5 + $0x10] sm:$0xff] %vm943_vm2, %v3050_v15  ;;  %947 = vst.msk [vmem:[#allocation5 + $0x18] sm:$0xff] %vm943_vm2, %v3050_v15  ;;  %v792_v56 = vunpack.c.l.s4 %v3055_v55  ;;  %v3056_v58 = vmov 1934713408  }
  0x41   : > { %v2549_v39 = vld [vmem:[%s3696_s7] ss:$0 sm:$0xff]  ;;  %v824_v59 = vunpack.c.l.s4 %v3056_v58  ;;  %vm929_vm3 = vcmask 60416   ;;  %vm934_vm4 = vcmask 7168   ;;  %vm1720_vm6 = vcmask 1043456   ;;  %s654_s19 = sand.u32 1, %s3028_s28  }
  0x42   : > { %s3259_s25 = scalar_lea.vmem %s3731_s24, %s2545_s0  ;;  %s3733_s24 = sld [smem:[#allocation24_spill]]  ;;  %v2557_v45 = vld [vmem:[%s3697_s8] ss:$0 sm:$0xff]  ;;  %v793_v60 = vunpack.c.0.s8 %v792_v56  ;;  %939 = vst.msk [vmem:[#allocation4] sm:$0xff] %vm934_vm4, %v3050_v15  ;;  %940 = vst.msk [vmem:[#allocation4 + $0x8] sm:$0xff] %vm934_vm4, %v3050_v15 }
  0x43   : > { %s672_s22 = scalar_lea.vmem %s3732_s20, %s2545_s0  ;;  %v680_v0 = vld [vmem:[%s3259_s25] sm:$0xff]  ;;  %2649 = vmatpush3.bf16.msra.mxu1 %v2860_v16  ;;  %s3053_s20 = smov 112   ;;  %v825_v63 = vunpack.c.0.s8 %v824_v59  ;;  %941 = vst.msk [vmem:[#allocation4 + $0x10] sm:$0xff] %vm934_vm4, %v3050_v15  ;;  %942 = vst.msk [vmem:[#allocation4 + $0x18] sm:$0xff] %vm934_vm4, %v3050_v15 }
  0x44   : > { %v952_v1 = vld [vmem:[%s672_s22] sm:$0xff]  ;;  %v684_v2 = vsel %vm683_vm0, %v680_v0, 0.0  ;;  %2654 = vmatprep.subr.bf16.mxu1 %v3050_v15  ;;  %s2544_s21 = sshll.u32 %s654_s19, 3  ;;  %s2598_s26 = sshll.u32 %s3036_s30, 7 }
  0x45   : > { %v956_v3 = vsel %vm683_vm0, %v952_v1, 0.0  ;;  %685 = vadd.xlane.f32.xlu0 %v684_v2  ;;  %s2410_s30 = scalar_lea.sflag [#allocation8], %s654_s19  ;;  %p3734_p10 = scmp.ne.s32.totalorder %s3724_s2, 0 }
  0x46   : > { %s3059_s0 = smov [#allocation11]  }
  0x48   : > { %v2547_v24 = vld [vmem:[%s3733_s24] ss:$0 sm:$0xff] }
  0x49   : > { %957 = vadd.xlane.f32.xlu0 %v956_v3 }
  0xce   : > { %v686_v4 = vpop.xlane.xlu0 %685 }
  0xcf   : > { %v688_v5 = vmul.f32 0.03125, %v686_v4 }
  0xd1   : > { %v689_v6 = vsub.f32 %v680_v0, %v688_v5  ;;  %v3345_v0 = vsub.s32 %v793_v60, %v3342_v61 }
  0xd2   : > { %v958_v7 = vpop.xlane.xlu0 %957 }
  0xd3   : > { %v960_v8 = vmul.f32 0.03125, %v958_v7  ;;  %v690_v9 = vmul.f32 %v689_v6, %v689_v6  ;;  %v3348_v7 = vsub.s32 %v825_v63, %v3342_v61 }
  0xd5   : > { %v961_v10 = vsub.f32 %v952_v1, %v960_v8  ;;  %v691_v11 = vsel %vm683_vm0, %v690_v9, 0.0 }
  0xd6   : > { %692 = vadd.xlane.f32.xlu1 %v691_v11 }
  0xd7   : > { %v962_v12 = vmul.f32 %v961_v10, %v961_v10 }
  0xd9   : > { %v963_v13 = vsel %vm683_vm0, %v962_v12, 0.0 }
  0xda   : > { %964 = vadd.xlane.f32.xlu1 %v963_v13 }
 0x15f   : > { %v693_v17 = vpop.xlane.xlu1 %692 }
 0x160   : > { %v694_v18 = vmul.f32 0.03125, %v693_v17 }
 0x162   : > { %v695_v19 = vadd.f32 1e-05, %v694_v18 }
 0x163   : > { %v965_v20 = vpop.xlane.xlu1 %964 }
 0x164   : > { %2875 = vrsqrt.f32 %v695_v19  ;;  %v966_v21 = vmul.f32 0.03125, %v965_v20 }
 0x166   : > { %v967_v22 = vadd.f32 1e-05, %v966_v21 }
 0x168   : > { %2877 = vrsqrt.f32 %v967_v22 }
 0x171   : > { %v2876_v23 = vpop.eup %2875 }
 0x172   : > { %v697_v25 = vmul.f32 %v2876_v23, %v689_v6 }
 0x174   : > { %v704_v27 = vmul.f32 %v2547_v24, %v697_v25 }
 0x175   : > { %v2878_v28 = vpop.eup %2877 }
 0x176   : > { %v969_v29 = vmul.f32 %v2878_v28, %v961_v10  ;;  %v711_v30 = vadd.f32 %v2548_v26, %v704_v27 }
 0x178   : > { %v712_v32 = vpack.c.bf16 %v711_v30, %v711_v30  ;;  %v976_v33 = vmul.f32 %v2547_v24, %v969_v29 }
 0x17a   : > { %2651 = vmatmul.mubr.msk.bf16.vlgmr.msra.gmra.mxu1 %vm683_vm0, %v712_v32  ;;  %v983_v35 = vadd.f32 %v2548_v26, %v976_v33 }
 0x17b   : > { %2655 = vmatpush3.bf16.msra.mxu1 %v2861_v31  ;;  %2658 = vmatprep.mubr.msk.bf16.mxu1 %vm3051_vm1, %v3050_v15 }
 0x17c   : > { %2656 = vmatprep.subr.bf16.mxu1 %v3050_v15  ;;  %v984_v37 = vpack.c.bf16 %v983_v35, %v983_v35 }
 0x17f   : > { %2657 = vmatpush3.bf16.msra.mxu1 %v2862_v34 }
 0x180   : > { %2662 = vmatprep.subr.bf16.mxu1 %v3050_v15 }
 0x182   : > { %2659 = vmatmul.mubr.msk.bf16.vlgmr.msra.gmra.mxu1 %vm683_vm0, %v984_v37 }
 0x183   : > { %2663 = vmatpush3.bf16.msra.mxu1 %v2863_v36  ;;  %2666 = vmatprep.mubr.msk.bf16.mxu1 %vm3051_vm1, %v3050_v15 }
 0x184   : > { %2664 = vmatprep.subr.bf16.mxu1 %v3050_v15 }
 0x187   : > { %2665 = vmatpush3.bf16.msra.mxu1 %v2864_v38 }
 0x188   : > { %2670 = vmatprep.subr.bf16.mxu1 %v3050_v15 }
 0x18a   : > { %2667 = vmatmul.mubr.msk.bf16.vlgmr.msra.gmra.mxu1 %vm683_vm0, %v984_v37 }
 0x18b   : > { %2672 = vmatprep.mubr.msk.bf16.mxu1 %vm3051_vm1, %v3050_v15 }
 0x23a   : > { %v773_v40 = vpop.f32.mrf.mxu1 }
 0x23b   : > { %v774_v41 = vadd.f32 %v2549_v39, %v773_v40 }
 0x23c   : > { %v2652_v42 = vpop.f32.mrf.mxu1 }
 0x23d   : > { %780 = vrot.lane.b32.xlu0 %v774_v41, %s3052_s23  ;;  %783 = vrot.lane.b32.xlu1 %v774_v41, %s3053_s20 }
 0x23e   : > { %v776_v43 = vpop.f32.mrf.mxu1 }
 0x240   : > { %v2653_v44 = vpop.f32.mrf.mxu1 }
 0x241   : > { %786 = vrot.lane.b32.xlu1 %v774_v41, %s3054_s1 }
 0x242   : > { %v1045_v46 = vpop.f32.mrf.mxu1 }
 0x243   : > { %v3323_v47 = vadd.f32 %v2557_v45, %v1045_v46 }
 0x244   : > { %v2660_v48 = vpop.f32.mrf.mxu1 }
 0x245   : > { %1118 = vrot.lane.b32.xlu0 %v3323_v47, %s3053_s20  ;;  %1115 = vrot.lane.b32.xlu1 %v3323_v47, %s3052_s23 }
 0x246   : > { %v1048_v49 = vpop.f32.mrf.mxu1 }
 0x248   : > { %v2661_v50 = vpop.f32.mrf.mxu1 }
 0x249   : > { %1121 = vrot.lane.b32.xlu1 %v3323_v47, %s3054_s1 }
 0x24a   : > { %v3339_v51 = vpop.f32.mrf.mxu1 }
 0x24c   : > { %v2668_v52 = vpop.f32.mrf.mxu1 }
 0x24e   : > { %v1111_v53 = vpop.f32.mrf.mxu1 }
 0x250   : > { %v2669_v54 = vpop.f32.mrf.mxu1 }
 0x2af   : > { %v784_v62 = vpop.permute.xlu1 %783  ;;  %v781_v3 = vpop.permute.xlu0 %780 }
 0x2b0   : > { %v789_v1 = vcombine.low %v774_v41, %v784_v62  ;;  %v790_v2 = vcombine.high %v774_v41, %v784_v62 }
 0x2b2   : > { %v797_v8 = vrot.slane %v789_v1, %v3345_v0  ;;  %v804_v9 = vrot.slane %v790_v2, %v3345_v0 }
 0x2b3   : > { %v787_v4 = vpop.permute.xlu1 %786 }
 0x2b4   : > { %v805_v5 = vcombine.low %v781_v3, %v787_v4  ;;  %v806_v6 = vcombine.high %v781_v3, %v787_v4 }
 0x2b6   : > { %v813_v10 = vrot.slane %v805_v5, %v3345_v0  ;;  %v820_v11 = vrot.slane %v806_v6, %v3345_v0 }
 0x2b7   : > { %v1116_v12 = vpop.permute.xlu1 %1115  ;;  %v1119_v18 = vpop.permute.xlu0 %1118 }
 0x2b8   : > { %v821_v13 = vcombine.low %v797_v8, %v813_v10  ;;  %v822_v14 = vcombine.high %v797_v8, %v813_v10  ;;  %v837_v16 = vcombine.low %v804_v9, %v820_v11  ;;  %v838_v17 = vcombine.high %v804_v9, %v820_v11 }
 0x2b9   : > { %v1124_v23 = vcombine.low %v3323_v47, %v1119_v18  ;;  %v1125_v24 = vcombine.high %v3323_v47, %v1119_v18 }
 0x2ba   : > { %v829_v19 = vrot.slane %v821_v13, %v3348_v7  ;;  %v836_v20 = vrot.slane %v822_v14, %v3348_v7  ;;  %v845_v21 = vrot.slane %v837_v16, %v3348_v7  ;;  %v852_v22 = vrot.slane %v838_v17, %v3348_v7 }
 0x2bb   : > { %v1122_v25 = vpop.permute.xlu1 %1121  ;;  %v1132_v36 = vrot.slane %v1124_v23, %v3345_v0  ;;  %v1139_v37 = vrot.slane %v1125_v24, %v3345_v0 }
 0x2bc   : > { %v857_v26 = vcombine.low %v829_v19, %v836_v20  ;;  %v2553_v27 = vcombine.high %v829_v19, %v836_v20  ;;  %v873_v28 = vcombine.low %v845_v21, %v852_v22  ;;  %v2554_v29 = vcombine.high %v845_v21, %v852_v22 }
 0x2bd   : > { %v1140_v30 = vcombine.low %v1116_v12, %v1122_v25  ;;  %v1141_v31 = vcombine.high %v1116_v12, %v1122_v25 }
 0x2be   : > { %v864_v32 = vrot.slane %v857_v26, %v3345_v0  ;;  %v872_v33 = vrot.slane %v2553_v27, %v3345_v0  ;;  %v880_v34 = vrot.slane %v873_v28, %v3345_v0  ;;  %v888_v35 = vrot.slane %v2554_v29, %v3345_v0 }
 0x2bf   : > { %v1148_v38 = vrot.slane %v1140_v30, %v3345_v0  ;;  %v1155_v39 = vrot.slane %v1141_v31, %v3345_v0 }
 0x2c0   : > { %v889_v40 = vcombine.low %v864_v32, %v872_v33  ;;  %v890_v41 = vcombine.high %v864_v32, %v872_v33  ;;  %v905_v42 = vcombine.low %v880_v34, %v888_v35  ;;  %v906_v43 = vcombine.high %v880_v34, %v888_v35 }
 0x2c1   : > { %v1156_v44 = vcombine.low %v1132_v36, %v1148_v38  ;;  %v1157_v45 = vcombine.high %v1132_v36, %v1148_v38  ;;  %v1172_v46 = vcombine.low %v1139_v37, %v1155_v39  ;;  %v1173_v47 = vcombine.high %v1139_v37, %v1155_v39 }
 0x2c2   : > { %v897_v48 = vrot.slane %v889_v40, %v3348_v7  ;;  %v904_v49 = vrot.slane %v890_v41, %v3348_v7  ;;  %v913_v50 = vrot.slane %v905_v42, %v3348_v7  ;;  %v920_v52 = vrot.slane %v906_v43, %v3348_v7 }
 0x2c3   : > { %v1164_v53 = vrot.slane %v1156_v44, %v3348_v7  ;;  %v1171_v54 = vrot.slane %v1157_v45, %v3348_v7  ;;  %v1180_v55 = vrot.slane %v1172_v46, %v3348_v7  ;;  %v1187_v56 = vrot.slane %v1173_v47, %v3348_v7 }
 0x2c4   : > { %v921_v58 = vcombine.low %v897_v48, %v913_v50  ;;  %v922_v59 = vcombine.high %v897_v48, %v913_v50  ;;  %v923_v60 = vcombine.low %v904_v49, %v920_v52  ;;  %v924_v62 = vcombine.high %v904_v49, %v920_v52 }
 0x2c5   : > { %v1192_v63 = vcombine.low %v1164_v53, %v1171_v54  ;;  %v2565_v1 = vcombine.high %v1164_v53, %v1171_v54  ;;  %v1208_v2 = vcombine.low %v1180_v55, %v1187_v56  ;;  %v2566_v3 = vcombine.high %v1180_v55, %v1187_v56 }
 0x2c6   : > { %v925_v4 = vpack.c.bf16 %v921_v58, %v921_v58  ;;  %v926_v5 = vpack.c.bf16 %v922_v59, %v922_v59  ;;  %v927_v6 = vpack.c.bf16 %v923_v60, %v923_v60  ;;  %v928_v8 = vpack.c.bf16 %v924_v62, %v924_v62 }
 0x2c7   : > { %v1199_v9 = vrot.slane %v1192_v63, %v3345_v0  ;;  %v1207_v10 = vrot.slane %v2565_v1, %v3345_v0  ;;  %v1215_v11 = vrot.slane %v1208_v2, %v3345_v0  ;;  %v1223_v12 = vrot.slane %v2566_v3, %v3345_v0  ;;  %v2561_v3 = vld [vmem:[%s3698_s9] ss:$0 sm:$0xff] }
 0x2c8   : > { %930 = vst.msk [vmem:[#allocation2] sm:$0xf] %vm929_vm3, %v925_v4  ;;  %931 = vst.msk [vmem:[#allocation2 + $0x4] sm:$0xf] %vm929_vm3, %v926_v5  ;;  %v3057_v38 = vmov -inf   ;;  %v1610_v39 = vand.u32 127, %v794_v57 }
 0x2c9   : > { %932 = vst.msk [vmem:[#allocation2 + $0x8] sm:$0xf] %vm929_vm3, %v927_v6  ;;  %933 = vst.msk [vmem:[#allocation2 + $0xc] sm:$0xf] %vm929_vm3, %v928_v8  ;;  %v1224_v13 = vcombine.low %v1199_v9, %v1207_v10  ;;  %v1240_v14 = vcombine.low %v1215_v11, %v1223_v12  ;;  %v1225_v16 = vcombine.high %v1199_v9, %v1207_v10  ;;  %v3058_v4 = vmov 0  }
 0x2ca   : > { %v1241_v17 = vcombine.high %v1215_v11, %v1223_v12  ;;  %936 = vst.msk [vmem:[#allocation3 + $0x8] sm:$0xff] %vm934_vm4, %v3057_v38  ;;  %935 = vst.msk [vmem:[#allocation3] sm:$0xff] %vm934_vm4, %v3057_v38  ;;  %vm1613_vm5 = vcmp.ge.s32.totalorder %v3342_v61, %v1610_v39  ;;  %2858 = vset.pattern.permute.xlu1 %v3058_v4  ;;  %2857 = vset.pattern.permute.xlu0 %v3058_v4 }
 0x2cb   : > { %v1232_v18 = vrot.slane %v1224_v13, %v3348_v7  ;;  %v1248_v19 = vrot.slane %v1240_v14, %v3348_v7  ;;  %v1239_v22 = vrot.slane %v1225_v16, %v3348_v7  ;;  %937 = vst.msk [vmem:[#allocation3 + $0x10] sm:$0xff] %vm934_vm4, %v3057_v38  ;;  %938 = vst.msk [vmem:[#allocation3 + $0x18] sm:$0xff] %vm934_vm4, %v3057_v38 }
 0x2cc   : > { %v1255_v23 = vrot.slane %v1241_v17, %v3348_v7  ;;  %v1109_v61 = vadd.f32 %v2561_v3, %v3339_v51 }
 0x2cd   : > { %v1256_v20 = vcombine.low %v1232_v18, %v1248_v19  ;;  %v1257_v21 = vcombine.high %v1232_v18, %v1248_v19 }
 0x2ce   : > { %v1258_v28 = vcombine.low %v1239_v22, %v1255_v23  ;;  %v1259_v29 = vcombine.high %v1239_v22, %v1255_v23 }
 0x2cf   : > { %v1260_v24 = vpack.c.bf16 %v1256_v20, %v1256_v20  ;;  %v1261_v25 = vpack.c.bf16 %v1257_v21, %v1257_v21  ;;  %v1414_v32 = vld [vmem:[#allocation2] sm:$0xf]  ;;  %v1415_v33 = vld [vmem:[#allocation2 + $0x4] sm:$0xf] }
 0x2d0   : > { %v1262_v30 = vpack.c.bf16 %v1258_v28, %v1258_v28  ;;  %v1263_v31 = vpack.c.bf16 %v1259_v29, %v1259_v29  ;;  %v1416_v36 = vld [vmem:[#allocation2 + $0x8] sm:$0xf]  ;;  %v1417_v37 = vld [vmem:[#allocation2 + $0xc] sm:$0xf] }
 0x2d1   : > { %v1423_v26 = vsel %vm943_vm2, %v1260_v24, 0  ;;  %v1469_v27 = vsel %vm943_vm2, %v1261_v25, 0  ;;  %v3453_v5 = vld [vmem:[#allocation3 + $0x8] sm:$0xff]  ;;  %v3455_v6 = vld [vmem:[#allocation3] sm:$0xff] }
 0x2d2   : > { %2671 = vmatpush3.bf16.xpose.msra.mxu1 %v1423_v26  ;;  %2677 = vmatpush3.bf16.xpose.msra.mxu0 %v1469_v27  ;;  %v1515_v34 = vsel %vm943_vm2, %v1262_v30, 0  ;;  %v1561_v35 = vsel %vm943_vm2, %v1263_v31, 0  ;;  %v3473_v14 = vld [vmem:[#allocation3 + $0x10] sm:$0xff]  ;;  %v3478_v20 = vld [vmem:[#allocation3 + $0x18] sm:$0xff] }
 0x2d3   : > { %2682 = vmatprep.subr.bf16.mxu1 %v3050_v15  ;;  %2688 = vmatprep.subr.bf16.mxu0 %v3050_v15 }
 0x2d9   : > { %2673 = vmatmul.mubr.msk.bf16.vlgmr.msra.gmra.mxu1 %vm943_vm2, %v1414_v32  ;;  %2679 = vmatmul.mubr.msk.bf16.vlgmr.msra.gmra.mxu0 %vm943_vm2, %v1415_v33 }
 0x2da   : > { %2683 = vmatpush3.bf16.xpose.msra.mxu1 %v1515_v34  ;;  %2689 = vmatpush3.bf16.xpose.msra.mxu0 %v1561_v35 }
 0x2db   : > { %2684 = vmatprep.mubr.msk.bf16.mxu1 %vm3051_vm1, %v3050_v15  ;;  %2690 = vmatprep.mubr.msk.bf16.mxu0 %vm3051_vm1, %v3050_v15 }
 0x2dc   : > { %2694 = vmatprep.subr.bf16.mxu1 %v3050_v15  ;;  %2700 = vmatprep.subr.bf16.mxu0 %v3050_v15 }
 0x2e1   : > { %2685 = vmatmul.mubr.msk.bf16.vlgmr.msra.gmra.mxu1 %vm943_vm2, %v1416_v36  ;;  %2691 = vmatmul.mubr.msk.bf16.vlgmr.msra.gmra.mxu0 %vm943_vm2, %v1417_v37 }
 0x2e2   : > { %2696 = vmatprep.mubr.msk.bf16.mxu1 %vm3051_vm1, %v3050_v15  ;;  %2702 = vmatprep.mubr.msk.bf16.mxu0 %vm3051_vm1, %v3050_v15 }
 0x399   : > { %v1459_v40 = vpop.f32.mrf.mxu1  ;;  %v1505_v41 = vpop.f32.mrf.mxu0 }
 0x39a   : > { %v3424_v42 = vsel %vm1613_vm5, %v1459_v40, -1e+30  ;;  %v3428_v43 = vsel %vm1613_vm5, %v1505_v41, -1e+30 }
 0x39b   : > { %v2674_v44 = vpop.f32.mrf.mxu1  ;;  %v2680_v45 = vpop.f32.mrf.mxu0  ;;  %v1627_v46 = vsel %vm943_vm2, %v3428_v43, -inf  ;;  %v1624_v57 = vsel %vm943_vm2, %v3424_v42, -inf }
 0x39c   : > { %1628 = vmax.xlane.f32.xlu1 %v1627_v46  ;;  %1625 = vmax.xlane.f32.xlu0 %v1624_v57 }
 0x39d   : > { %v1462_v47 = vpop.f32.mrf.mxu1  ;;  %v1508_v48 = vpop.f32.mrf.mxu0 }
 0x39f   : > { %v2675_v49 = vpop.f32.mrf.mxu1  ;;  %v2681_v50 = vpop.f32.mrf.mxu0 }
 0x3a1   : > { %v1551_v52 = vpop.f32.mrf.mxu1  ;;  %v1597_v53 = vpop.f32.mrf.mxu0 }
 0x3a2   : > { %v3436_v54 = vsel %vm1613_vm5, %v1551_v52, -1e+30  ;;  %v3442_v59 = vsel %vm1613_vm5, %v1597_v53, -1e+30 }
 0x3a3   : > { %v2686_v55 = vpop.f32.mrf.mxu1  ;;  %v2692_v56 = vpop.f32.mrf.mxu0  ;;  %v1630_v58 = vsel %vm943_vm2, %v3436_v54, -inf  ;;  %v1633_v2 = vsel %vm943_vm2, %v3442_v59, -inf }
 0x3a4   : > { %1631 = vmax.xlane.f32.xlu0 %v1630_v58 }
 0x3a5   : > { %v1554_v60 = vpop.f32.mrf.mxu1  ;;  %v1600_v62 = vpop.f32.mrf.mxu0 }
 0x3a7   : > { %v2687_v63 = vpop.f32.mrf.mxu1  ;;  %v2693_v1 = vpop.f32.mrf.mxu0 }
 0x3a8   : > { %1634 = vmax.xlane.f32.xlu0 %v1633_v2 }
 0x3ad   : > { %1265 = vrot.lane.b32.xlu1 %v1109_v61, %s3052_s23  ;;  %s656_s23 = scalar_lea.vmem [#allocation11], %s2544_s21  ;;  %s2964_s21 = sshll.u32 %s3059_s0, 4  ;;  %s2965_s21 = int_to_ptr.vmem [resolvable:$false] %s2964_s21 }
 0x3b1   : > { %1268 = vrot.lane.b32.xlu1 %v1109_v61, %s3053_s20  ;;  %s2424_s20 = sshll.u32 %s656_s23, 4  ;;  %s3644_s20 = int_to_ptr.vmem [resolvable:$true] %s2424_s20 }
 0x3b2   : > { %s2960_s29 = scalar_lea.vmem %s3644_s20, 128  ;;  %p2967_p0 = scmp.lt.s32.totalorder %s3644_s20, %s2965_s21 }
 0x3b3   : > { %p2961_p8 = scmp.ne.s32.totalorder %s3644_s20, %s2960_s29 }
 0x3b5   : > { %1271 = vrot.lane.b32.xlu1 %v1109_v61, %s3054_s1  ;;  %s3642_s1 = scalar_lea.hbm %s3707_s18, %s2598_s26  ;;  %p2962_p11 = pnand %p2961_p8, %p3734_p10 }
 0x3b7   : > { %p2963_p13 = pneg %p2962_p11 }
 0x425   : > { %v1629_v8 = vpop.xlane.xlu1 %1628  ;;  %v1626_v9 = vpop.xlane.xlu0 %1625 }
 0x426   : > { %v3458_v10 = vmax.f32 %v3453_v5, %v1629_v8  ;;  %v3461_v11 = vmax.f32 %v3455_v6, %v1626_v9 }
 0x428   : > { %v1641_v51 = vsub.f32 %v3453_v5, %v3458_v10  ;;  %1939 = vst.msk [vmem:[#allocation3 + $0x8] sm:$0xff] %vm934_vm4, %v3458_v10  ;;  %v1640_v12 = vsub.f32 %v3455_v6, %v3461_v11  ;;  %1938 = vst.msk [vmem:[#allocation3] sm:$0xff] %vm934_vm4, %v3461_v11  ;;  %1659 = vperm.xlu1 %2858, %v3458_v10   ;;  %1654 = vperm.xlu0 %2857, %v3461_v11  }
 0x429   : > { %v1266_v13 = vpop.permute.xlu1 %1265 }
 0x42a   : > { %v1646_v11 = vmul.f32 1.442695, %v1641_v51 }
 0x42d   : > { %v1269_v16 = vpop.permute.xlu1 %1268  ;;  %v1632_v17 = vpop.xlane.xlu0 %1631 }
 0x42e   : > { %v3476_v18 = vmax.f32 %v3473_v14, %v1632_v17  ;;  %v1274_v19 = vcombine.low %v1109_v61, %v1269_v16  ;;  %v1275_v21 = vcombine.high %v1109_v61, %v1269_v16 }
 0x430   : > { %v1642_v22 = vsub.f32 %v3473_v14, %v3476_v18  ;;  %1940 = vst.msk [vmem:[#allocation3 + $0x10] sm:$0xff] %vm934_vm4, %v3476_v18  ;;  %1664 = vperm.xlu1 %2858, %v3476_v18   ;;  %v1282_v28 = vrot.slane %v1274_v19, %v3345_v0  ;;  %v1289_v29 = vrot.slane %v1275_v21, %v3345_v0 }
 0x431   : > { %v1272_v23 = vpop.permute.xlu1 %1271  ;;  %v1635_v24 = vpop.xlane.xlu0 %1634 }
 0x432   : > { %v1290_v25 = vcombine.low %v1266_v13, %v1272_v23  ;;  %v1291_v26 = vcombine.high %v1266_v13, %v1272_v23  ;;  %v3486_v27 = vmax.f32 %v3478_v20, %v1635_v24 }
 0x434   : > { %v1298_v30 = vrot.slane %v1290_v25, %v3345_v0  ;;  %v1305_v31 = vrot.slane %v1291_v26, %v3345_v0  ;;  %v1643_v32 = vsub.f32 %v3478_v20, %v3486_v27  ;;  %1941 = vst.msk [vmem:[#allocation3 + $0x18] sm:$0xff] %vm934_vm4, %v3486_v27  ;;  %1669 = vperm.xlu1 %2858, %v3486_v27   ;;  %v1685_v20 = vld [vmem:[#allocation4 + $0x8] sm:$0xff]  ;;  %v1684_v27 = vld [vmem:[#allocation4] sm:$0xff] }
 0x436   : > { %v1306_v33 = vcombine.low %v1282_v28, %v1298_v30  ;;  %v1307_v34 = vcombine.high %v1282_v28, %v1298_v30  ;;  %v1322_v35 = vcombine.low %v1289_v29, %v1305_v31  ;;  %v1323_v36 = vcombine.high %v1289_v29, %v1305_v31 }
 0x437   : > { %v1650_v6 = vmul.f32 1.442695, %v1643_v32 }
 0x438   : > { %v1314_v37 = vrot.slane %v1306_v33, %v3348_v7  ;;  %v1321_v38 = vrot.slane %v1307_v34, %v3348_v7  ;;  %v1330_v39 = vrot.slane %v1322_v35, %v3348_v7  ;;  %v1337_v40 = vrot.slane %v1323_v36, %v3348_v7 }
 0x43a   : > { %v1342_v41 = vcombine.low %v1314_v37, %v1321_v38  ;;  %v2567_v44 = vcombine.high %v1314_v37, %v1321_v38  ;;  %v1358_v45 = vcombine.low %v1330_v39, %v1337_v40  ;;  %v2568_v46 = vcombine.high %v1330_v39, %v1337_v40 }
 0x43b   : > { %v1644_v37 = vmul.f32 1.442695, %v1640_v12 }
 0x43c   : > { %v1349_v57 = vrot.slane %v1342_v41, %v3345_v0  ;;  %v1357_v47 = vrot.slane %v2567_v44, %v3345_v0  ;;  %v1365_v48 = vrot.slane %v1358_v45, %v3345_v0  ;;  %v1373_v49 = vrot.slane %v2568_v46, %v3345_v0  ;;  %v1986_v46 = vld [vmem:[#allocation6] sm:$0xf] }
 0x43d   : > { %v1648_v41 = vmul.f32 1.442695, %v1642_v22 }
 0x43e   : > { %v1374_v50 = vcombine.low %v1349_v57, %v1357_v47  ;;  %v1390_v52 = vcombine.low %v1365_v48, %v1373_v49  ;;  %v1375_v53 = vcombine.high %v1349_v57, %v1357_v47  ;;  %v1391_v55 = vcombine.high %v1365_v48, %v1373_v49  ;;  %v1686_v49 = vld [vmem:[#allocation4 + $0x10] sm:$0xff] }
 0x43f   : > { %v1996_v57 = vsel %vm1720_vm6, %v1986_v46, 0 }
 0x440   : > { %v1382_v56 = vrot.slane %v1374_v50, %v3348_v7  ;;  %v1398_v58 = vrot.slane %v1390_v52, %v3348_v7  ;;  %v1389_v60 = vrot.slane %v1375_v53, %v3348_v7  ;;  %v1405_v62 = vrot.slane %v1391_v55, %v3348_v7  ;;  %v1687_v53 = vld [vmem:[#allocation4 + $0x18] sm:$0xff] }
 0x442   : > { %v1406_v63 = vcombine.low %v1382_v56, %v1398_v58  ;;  %v1407_v1 = vcombine.high %v1382_v56, %v1398_v58  ;;  %v1408_v2 = vcombine.low %v1389_v60, %v1405_v62  ;;  %v1409_v3 = vcombine.high %v1389_v60, %v1405_v62 }
 0x444   : > { %v1410_v4 = vpack.c.bf16 %v1406_v63, %v1406_v63  ;;  %v1411_v61 = vpack.c.bf16 %v1407_v1, %v1407_v1  ;;  %v1413_v29 = vpack.c.bf16 %v1409_v3, %v1409_v3  ;;  %v1412_v31 = vpack.c.bf16 %v1408_v2, %v1408_v2  ;;  %v1987_v3 = vld [vmem:[#allocation6 + $0x4] sm:$0xf] }
 0x446   : > { %v1722_v0 = vsel %vm1720_vm6, %v1410_v4, 0  ;;  %v1768_v8 = vsel %vm1720_vm6, %v1411_v61, 0  ;;  %v2042_v4 = vsel %vm1720_vm6, %v1987_v3, 0 }
 0x447   : > { %2695 = vmatpush3.bf16.msra.mxu1 %v1722_v0  ;;  %2701 = vmatpush3.bf16.msra.mxu0 %v1768_v8 }
 0x448   : > { %2706 = vmatprep.subr.bf16.mxu1 %v3050_v15  ;;  %2712 = vmatprep.subr.bf16.mxu0 %v3050_v15 }
 0x4a3   : > { %v1660_v9 = vpop.permute.xlu1 %1659  ;;  %v1655_v13 = vpop.permute.xlu0 %1654 }
 0x4a4   : > { %v1673_v7 = vsub.f32 %v3428_v43, %v1660_v9  ;;  %v1672_v16 = vsub.f32 %v3424_v42, %v1655_v13 }
 0x4a6   : > { %v1678_v17 = vmul.f32 1.442695, %v1673_v7  ;;  %v1676_v19 = vmul.f32 1.442695, %v1672_v16  ;;  %v1903_v7 = vld [vmem:[#allocation5 + $0x8] sm:$0xff] }
 0x4a8   : > { %2879 = vpow2.f32 %v1678_v17  ;;  %v1902_v17 = vld [vmem:[#allocation5] sm:$0xff] }
 0x4a9   : > { %2881 = vpow2.f32 %v1676_v19 }
 0x4ab   : > { %v1665_v21 = vpop.permute.xlu1 %1664 }
 0x4ac   : > { %v1674_v23 = vsub.f32 %v3436_v54, %v1665_v21  ;;  %v1860_v54 = vsel %vm1720_vm6, %v1413_v29, 0 }
 0x4ae   : > { %v1680_v24 = vmul.f32 1.442695, %v1674_v23 }
 0x4af   : > { %v1670_v25 = vpop.permute.xlu1 %1669 }
 0x4b0   : > { %2883 = vpow2.f32 %v1680_v24  ;;  %v1675_v26 = vsub.f32 %v3442_v59, %v1670_v25  ;;  %v1814_v59 = vsel %vm1720_vm6, %v1412_v31, 0 }
 0x4b2   : > { %v1682_v28 = vmul.f32 1.442695, %v1675_v26 }
 0x4b4   : > { %2885 = vpow2.f32 %v1682_v28 }
 0x4b5   : > { %v2880_v30 = vpop.eup %2879  ;;  %2887 = vpow2.f32 %v1644_v37 }
 0x4b6   : > { %v2882_v43 = vpop.eup %2881  ;;  %v1695_v42 = vsel %vm943_vm2, %v2880_v30, 0.0  ;;  %v1714_v33 = vpack.c.bf16 %v2880_v30, %v2880_v30  ;;  %2889 = vpow2.f32 %v1648_v41 }
 0x4b7   : > { %1696 = vadd.xlane.f32.xlu0 %v1695_v42  ;;  %v1692_v34 = vsel %vm943_vm2, %v2882_v43, 0.0  ;;  %v1713_v35 = vpack.c.bf16 %v2882_v43, %v2882_v43  ;;  %2891 = vpow2.f32 %v1650_v6  ;;  %v1904_v43 = vld [vmem:[#allocation5 + $0x10] sm:$0xff] }
 0x4b8   : > { %1693 = vadd.xlane.f32.xlu1 %v1692_v34  ;;  %2703 = vmatmul.mubr.msk.bf16.vlgmr.msra.gmra.mxu0 %vm943_vm2, %v1714_v33  ;;  %2893 = vpow2.f32 %v1646_v11 }
 0x4b9   : > { %2697 = vmatmul.mubr.msk.bf16.vlgmr.msra.gmra.mxu1 %vm943_vm2, %v1713_v35  ;;  %2713 = vmatpush3.bf16.msra.mxu0 %v1860_v54  ;;  %v1905_v54 = vld [vmem:[#allocation5 + $0x18] sm:$0xff] }
 0x4ba   : > { %2707 = vmatpush3.bf16.msra.mxu1 %v1814_v59  ;;  %2708 = vmatprep.mubr.msk.bf16.mxu1 %vm3051_vm1, %v3050_v15 }
 0x4bb   : > { %2714 = vmatprep.mubr.msk.bf16.mxu0 %vm3051_vm1, %v3050_v15  ;;  %2718 = vmatprep.subr.bf16.mxu1 %v3050_v15 }
 0x4bc   : > { %2724 = vmatprep.subr.bf16.mxu0 %v3050_v15 }
 0x4bd   : > { %v2884_v36 = vpop.eup %2883 }
 0x4be   : > { %v1698_v38 = vsel %vm943_vm2, %v2884_v36, 0.0  ;;  %v1715_v39 = vpack.c.bf16 %v2884_v36, %v2884_v36 }
 0x4bf   : > { %1699 = vadd.xlane.f32.xlu1 %v1698_v38 }
 0x4c1   : > { %v2886_v40 = vpop.eup %2885  ;;  %2709 = vmatmul.mubr.msk.bf16.vlgmr.msra.gmra.mxu1 %vm943_vm2, %v1715_v39 }
 0x4c2   : > { %v1701_v44 = vsel %vm943_vm2, %v2886_v40, 0.0  ;;  %v1716_v45 = vpack.c.bf16 %v2886_v40, %v2886_v40  ;;  %2720 = vmatprep.mubr.msk.bf16.mxu1 %vm3051_vm1, %v3050_v15  ;;  %v2888_v12 = vpop.eup %2887  ;;  %2719 = vmatpush3.bf16.msra.mxu1 %v1996_v57 }
 0x4c3   : > { %1702 = vadd.xlane.f32.xlu0 %v1701_v44  ;;  %v2890_v14 = vpop.eup %2889  ;;  %2730 = vmatprep.subr.bf16.mxu1 %v3050_v15  ;;  %v1688_v10 = vmul.f32 %v2888_v12, %v1684_v27  ;;  %v1988_v27 = vld [vmem:[#allocation6 + $0x8] sm:$0xf] }
 0x4c4   : > { %2715 = vmatmul.mubr.msk.bf16.vlgmr.msra.gmra.mxu0 %vm943_vm2, %v1716_v45  ;;  %v2892_v18 = vpop.eup %2891  ;;  %v1690_v50 = vmul.f32 %v2890_v14, %v1686_v49 }
 0x4c5   : > { %2726 = vmatprep.mubr.msk.bf16.mxu0 %vm3051_vm1, %v3050_v15  ;;  %v2894_v22 = vpop.eup %2893  ;;  %v1691_v58 = vmul.f32 %v2892_v18, %v1687_v53  ;;  %2725 = vmatpush3.bf16.msra.mxu0 %v2042_v4 }
 0x4c6   : > { %v1689_v5 = vmul.f32 %v2894_v22, %v1685_v20  ;;  %2736 = vmatprep.subr.bf16.mxu0 %v3050_v15 }
 0x4d0   : > { %1908 = vperm.xlu1 %2858, %v2888_v12  }
 0x4d4   : > { %1918 = vperm.xlu1 %2858, %v2890_v14  }
 0x4d8   : > { %1923 = vperm.xlu1 %2858, %v2892_v18  }
 0x4d9   : > { %1913 = vperm.xlu0 %2857, %v2894_v22   ;;  %v1989_v22 = vld [vmem:[#allocation6 + $0xc] sm:$0xf] }
 0x540   : > { %v1697_v51 = vpop.xlane.xlu0 %1696 }
 0x541   : > { %v1694_v32 = vpop.xlane.xlu1 %1693  ;;  %v1705_v47 = vadd.f32 %v1697_v51, %v1689_v5  ;;  %v2134_v51 = vsel %vm1720_vm6, %v1989_v22, 0 }
 0x542   : > { %v1704_v48 = vadd.f32 %v1694_v32, %v1688_v10 }
 0x543   : > { %1710 = vst.msk [vmem:[#allocation4 + $0x8] sm:$0xff] %vm934_vm4, %v1705_v47  ;;  %v2088_v47 = vsel %vm1720_vm6, %v1988_v27, 0  ;;  %v2871_v27 = vld [vmem:[%s3705_s16 + $0x18] sm:$0xff]  }
 0x544   : > { %1709 = vst.msk [vmem:[#allocation4] sm:$0xff] %vm934_vm4, %v1704_v48 }
 0x548   : > { %v1700_v52 = vpop.xlane.xlu1 %1699 }
 0x549   : > { %v1706_v55 = vadd.f32 %v1700_v52, %v1690_v50 }
 0x54a   : > { %v1947_v56 = vld [vmem:[#allocation4 + $0x8] sm:$0xff] }
 0x54b   : > { %1711 = vst.msk [vmem:[#allocation4 + $0x10] sm:$0xff] %vm934_vm4, %v1706_v55  ;;  %v1946_v60 = vld [vmem:[#allocation4] sm:$0xff]  ;;  %2895 = vrcp.f32 %v1947_v56 }
 0x54c   : > { %v1703_v62 = vpop.xlane.xlu0 %1702  ;;  %2897 = vrcp.f32 %v1946_v60  ;;  %v1909_v13 = vpop.permute.xlu1 %1908 }
 0x54d   : > { %v1707_v63 = vadd.f32 %v1703_v62, %v1691_v58  ;;  %v1926_v21 = vmul.f32 %v1909_v13, %v1902_v17 }
 0x54f   : > { %1712 = vst.msk [vmem:[#allocation4 + $0x18] sm:$0xff] %vm934_vm4, %v1707_v63 }
 0x550   : > { %v1919_v26 = vpop.permute.xlu1 %1918 }
 0x551   : > { %v1928_v35 = vmul.f32 %v1919_v26, %v1904_v43  ;;  %v2907_v43 = vld [vmem:[%s3259_s25] sm:$0xff]  ;;  %s2966_s25 = scalar_lea.vmem %s2965_s21, 256 }
 0x552   : > { %v1948_v1 = vld [vmem:[#allocation4 + $0x10] sm:$0xff]  ;;  %p2968_p6 = scmp.lt.s32.totalorder %s2966_s25, %s2960_s29 }
 0x553   : > { %2899 = vrcp.f32 %v1948_v1 }
 0x554   : > { %v1914_v16 = vpop.permute.xlu0 %1913  ;;  %v1924_v59 = vpop.permute.xlu1 %1923  ;;  %p2969_p7 = por %p2968_p6, %p2967_p0 }
 0x555   : > { %v1927_v19 = vmul.f32 %v1914_v16, %v1903_v7  ;;  %v1929_v38 = vmul.f32 %v1924_v59, %v1905_v54 }
 0x556   : > { %v1949_v2 = vld [vmem:[#allocation4 + $0x18] sm:$0xff]  ;;  %p2970_p9 = pnand %p2969_p7, %p2963_p13 }
 0x557   : > { %2901 = vrcp.f32 %v1949_v2 }
 0x558   : > { %v2896_v61 = vpop.eup %2895 }
 0x559   : > { %v2898_v0 = vpop.eup %2897  ;;  %1965 = vperm.xlu1 %2858, %v2896_v61  }
 0x55a   : > { %1960 = vperm.xlu0 %2857, %v2898_v0  }
 0x560   : > { %v2900_v8 = vpop.eup %2899 }
 0x561   : > { %1970 = vperm.xlu0 %2857, %v2900_v8  }
 0x564   : > { %v2902_v9 = vpop.eup %2901 }
 0x565   : > { %1975 = vperm.xlu1 %2858, %v2902_v9  }
 0x578   : > { %v1804_v23 = vpop.f32.mrf.mxu0 }
 0x579   : > { %v1758_v24 = vpop.f32.mrf.mxu1  ;;  %v1931_v25 = vadd.f32 %v1927_v19, %v1804_v23 }
 0x57a   : > { %v1930_v28 = vadd.f32 %v1926_v21, %v1758_v24  ;;  %v2704_v29 = vpop.f32.mrf.mxu0  ;;  %v2581_v24 = vld [vmem:[%s3700_s11] ss:$0 sm:$0xff] }
 0x57b   : > { %1935 = vst.msk [vmem:[#allocation5 + $0x8] sm:$0xff] %vm943_vm2, %v1931_v25  ;;  %v2698_v30 = vpop.f32.mrf.mxu1 }
 0x57c   : > { %1934 = vst.msk [vmem:[#allocation5] sm:$0xff] %vm943_vm2, %v1930_v28  ;;  %v1807_v31 = vpop.f32.mrf.mxu0 }
 0x57d   : > { %v1761_v42 = vpop.f32.mrf.mxu1 }
 0x57e   : > { %v2705_v33 = vpop.f32.mrf.mxu0 }
 0x57f   : > { %v2699_v34 = vpop.f32.mrf.mxu1 }
 0x581   : > { %v1850_v36 = vpop.f32.mrf.mxu1 }
 0x582   : > { %v1932_v37 = vadd.f32 %v1928_v35, %v1850_v36  ;;  %v1955_v18 = vld [vmem:[#allocation5 + $0x8] sm:$0xff] }
 0x583   : > { %v2710_v39 = vpop.f32.mrf.mxu1  ;;  %v1954_v20 = vld [vmem:[#allocation5] sm:$0xff] }
 0x584   : > { %1936 = vst.msk [vmem:[#allocation5 + $0x10] sm:$0xff] %vm943_vm2, %v1932_v37  ;;  %v1896_v40 = vpop.f32.mrf.mxu0  ;;  %v2865_v37 = vld [vmem:[#allocation9 + $0x8] sm:$0xff]   ;;  %v2867_v39 = vld [vmem:[%s3705_s16 + $0x38] sm:$0xff]  }
 0x585   : > { %v1853_v41 = vpop.f32.mrf.mxu1  ;;  %v1933_v44 = vadd.f32 %v1929_v38, %v1896_v40  ;;  %v2866_v38 = vld [vmem:[#allocation9] sm:$0xff]   ;;  %v2868_v40 = vld [vmem:[%s3705_s16 + $0x30] sm:$0xff]  }
 0x586   : > { %v2716_v45 = vpop.f32.mrf.mxu0 }
 0x587   : > { %1937 = vst.msk [vmem:[#allocation5 + $0x18] sm:$0xff] %vm943_vm2, %v1933_v44  ;;  %v2711_v6 = vpop.f32.mrf.mxu1 }
 0x588   : > { %v1899_v11 = vpop.f32.mrf.mxu0 }
 0x589   : > { %v2582_v11 = vld [vmem:[%s3701_s12] ss:$0 sm:$0xff] }
 0x58a   : > { %v2717_v12 = vpop.f32.mrf.mxu0 }
 0x58b   : > { %v1956_v49 = vld [vmem:[#allocation5 + $0x10] sm:$0xff] }
 0x58e   : > { %v1957_v53 = vld [vmem:[#allocation5 + $0x18] sm:$0xff] }
 0x5d4   : > { %v1966_v14 = vpop.permute.xlu1 %1965 }
 0x5d5   : > { %v1979_v46 = vmul.f32 %v1966_v14, %v1955_v18  ;;  %v1961_v57 = vpop.permute.xlu0 %1960  ;;  %v2583_v14 = vld [vmem:[%s3702_s13] ss:$0 sm:$0xff] }
 0x5d6   : > { %v1978_v5 = vmul.f32 %v1961_v57, %v1954_v20  ;;  %v2869_v57 = vld [vmem:[%s3705_s16 + $0x28] sm:$0xff]   ;;  %v2870_v20 = vld [vmem:[%s3705_s16 + $0x20] sm:$0xff]  }
 0x5d7   : > { %v1983_v10 = vpack.c.bf16 %v1979_v46, %v1979_v46 }
 0x5d8   : > { %v1982_v32 = vpack.c.bf16 %v1978_v5, %v1978_v5  ;;  %v2872_v5 = vld [vmem:[%s3705_s16 + $0x10] sm:$0xff]  }
 0x5d9   : > { %2727 = vmatmul.mubr.msk.bf16.vlgmr.msra.gmra.mxu0 %vm943_vm2, %v1983_v10  ;;  %v2873_v10 = vld [vmem:[%s3705_s16 + $0x8] sm:$0xff]  }
 0x5da   : > { %2721 = vmatmul.mubr.msk.bf16.vlgmr.msra.gmra.mxu1 %vm943_vm2, %v1982_v32  ;;  %2737 = vmatpush3.bf16.msra.mxu0 %v2134_v51  ;;  %v2874_v51 = vld [vmem:[%s3705_s16] sm:$0xff]  }
 0x5db   : > { %2731 = vmatpush3.bf16.msra.mxu1 %v2088_v47  ;;  %2732 = vmatprep.mubr.msk.bf16.mxu1 %vm3051_vm1, %v3050_v15  ;;  %v2584_v32 = vld [vmem:[%s3704_s15] ss:$0 sm:$0xff] }
 0x5dc   : > { %v1971_v48 = vpop.permute.xlu0 %1970  ;;  %2738 = vmatprep.mubr.msk.bf16.mxu0 %vm3051_vm1, %v3050_v15  ;;  %2742 = vmatprep.subr.bf16.mxu1 %v3050_v15 }
 0x5dd   : > { %v1980_v50 = vmul.f32 %v1971_v48, %v1956_v49  ;;  %2750 = vmatprep.subr.bf16.mxu0 %v3050_v15 }
 0x5df   : > { %v1984_v52 = vpack.c.bf16 %v1980_v50, %v1980_v50 }
 0x5e0   : > { %v1976_v55 = vpop.permute.xlu1 %1975 }
 0x5e1   : > { %v1981_v56 = vmul.f32 %v1976_v55, %v1957_v53 }
 0x5e2   : > { %2733 = vmatmul.mubr.msk.bf16.vlgmr.msra.gmra.mxu1 %vm943_vm2, %v1984_v52 }
 0x5e3   : > { %v1985_v58 = vpack.c.bf16 %v1981_v56, %v1981_v56  ;;  %2746 = vmatprep.mubr.msk.bf16.mxu1 %vm3051_vm1, %v3050_v15  ;;  %2743 = vmatpush3.bf16.msra.mxu1 %v2865_v37 }
 0x5e4   : > { %2744 = vmatprep.subr.bf16.mxu1 %v3050_v15 }
 0x5e5   : > { %2739 = vmatmul.mubr.msk.bf16.vlgmr.msra.gmra.mxu0 %vm943_vm2, %v1985_v58 }
 0x5e6   : > { %2766 = vmatprep.mubr.msk.bf16.mxu0 %vm3051_vm1, %v3050_v15  ;;  %2751 = vmatpush3.bf16.msra.mxu0 %v2867_v39 }
 0x5e7   : > { %2745 = vmatpush3.bf16.msra.mxu1 %v2866_v38  ;;  %2752 = vmatprep.subr.bf16.mxu0 %v3050_v15 }
 0x5ea   : > { %2753 = vmatpush3.bf16.msra.mxu0 %v2868_v40 }
 0x5eb   : > { %2754 = vmatprep.subr.bf16.mxu0 %v3050_v15 }
 0x5ee   : > { %2755 = vmatpush3.bf16.msra.mxu0 %v2869_v57 }
 0x5ef   : > { %2756 = vmatprep.subr.bf16.mxu0 %v3050_v15 }
 0x5f2   : > { %2757 = vmatpush3.bf16.msra.mxu0 %v2870_v20 }
 0x5f3   : > { %2758 = vmatprep.subr.bf16.mxu0 %v3050_v15 }
 0x5f6   : > { %2759 = vmatpush3.bf16.msra.mxu0 %v2871_v27 }
 0x5f7   : > { %2760 = vmatprep.subr.bf16.mxu0 %v3050_v15 }
 0x5fa   : > { %2761 = vmatpush3.bf16.msra.mxu0 %v2872_v5 }
 0x5fb   : > { %2762 = vmatprep.subr.bf16.mxu0 %v3050_v15 }
 0x5fe   : > { %2763 = vmatpush3.bf16.msra.mxu0 %v2873_v10 }
 0x5ff   : > { %2764 = vmatprep.subr.bf16.mxu0 %v3050_v15 }
 0x602   : > { %2765 = vmatpush3.bf16.msra.mxu0 %v2874_v51 }
 0x699   : > { %v2078_v60 = vpop.f32.mrf.mxu0 }
 0x69a   : > { %v2032_v62 = vpop.f32.mrf.mxu1  ;;  %v2178_v0 = vsel %vm683_vm0, %v2078_v60, 0.0 }
 0x69b   : > { %v2728_v63 = vpop.f32.mrf.mxu0  ;;  %v2177_v61 = vsel %vm683_vm0, %v2032_v62, 0.0  ;;  %v2588_v62 = vld [vmem:[%s3706_s17] ss:$0 sm:$0xff] }
 0x69c   : > { %v2722_v1 = vpop.f32.mrf.mxu1  ;;  %v2179_v13 = vadd.f32 %v2178_v0, %v2177_v61 }
 0x69d   : > { %v2081_v2 = vpop.f32.mrf.mxu0 }
 0x69e   : > { %v2035_v3 = vpop.f32.mrf.mxu1 }
 0x69f   : > { %v2729_v4 = vpop.f32.mrf.mxu0 }
 0x6a0   : > { %v2723_v8 = vpop.f32.mrf.mxu1 }
 0x6a2   : > { %v2124_v9 = vpop.f32.mrf.mxu1 }
 0x6a3   : > { %v2180_v7 = vsel %vm683_vm0, %v2124_v9, 0.0 }
 0x6a4   : > { %v2734_v16 = vpop.f32.mrf.mxu1  ;;  %v2181_v17 = vadd.f32 %v2180_v7, %v2179_v13 }
 0x6a5   : > { %v2170_v19 = vpop.f32.mrf.mxu0 }
 0x6a6   : > { %v2127_v21 = vpop.f32.mrf.mxu1  ;;  %v2182_v23 = vsel %vm683_vm0, %v2170_v19, 0.0 }
 0x6a7   : > { %v2183_v25 = vadd.f32 %v2182_v23, %v2181_v17  ;;  %v2740_v26 = vpop.f32.mrf.mxu0 }
 0x6a8   : > { %v2735_v28 = vpop.f32.mrf.mxu1 }
 0x6a9   : > { %v2191_v29 = vadd.f32 %v2581_v24, %v2183_v25  ;;  %v2173_v30 = vpop.f32.mrf.mxu0 }
 0x6ab   : > { %v2741_v31 = vpop.f32.mrf.mxu0  ;;  %v3585_v42 = vadd.f32 %v2907_v43, %v2191_v29 }
 0x6ad   : > { %v2195_v33 = vsel %vm683_vm0, %v3585_v42, 0.0 }
 0x6ae   : > { %2196 = vadd.xlane.f32.xlu0 %v2195_v33 }
 0x737   : > { %v2197_v34 = vpop.xlane.xlu0 %2196 }
 0x738   : > { %v2199_v35 = vmul.f32 0.03125, %v2197_v34 }
 0x73a   : > { %v2200_v54 = vsub.f32 %v3585_v42, %v2199_v35 }
 0x73c   : > { %v2201_v59 = vmul.f32 %v2200_v54, %v2200_v54 }
 0x73e   : > { %v2202_v36 = vsel %vm683_vm0, %v2201_v59, 0.0 }
 0x73f   : > { %2203 = vadd.xlane.f32.xlu1 %v2202_v36 }
 0x7c8   : > { %v2204_v41 = vpop.xlane.xlu1 %2203 }
 0x7c9   : > { %v2205_v44 = vmul.f32 0.03125, %v2204_v41 }
 0x7cb   : > { %v2206_v45 = vadd.f32 1e-05, %v2205_v44 }
 0x7cd   : > { %2903 = vrsqrt.f32 %v2206_v45 }
 0x7da   : > { %v2904_v6 = vpop.eup %2903 }
 0x7db   : > { %v2208_v12 = vmul.f32 %v2904_v6, %v2200_v54 }
 0x7dd   : > { %v2215_v18 = vmul.f32 %v2582_v11, %v2208_v12 }
 0x7df   : > { %v2222_v22 = vadd.f32 %v2583_v14, %v2215_v18 }
 0x7e1   : > { %v2223_v46 = vpack.c.bf16 %v2222_v22, %v2222_v22 }
 0x7e3   : > { %2747 = vmatmul.mubr.msk.bf16.vlgmr.msra.gmra.mxu1 %vm683_vm0, %v2223_v46 }
 0x8a3   : > { %v2284_v47 = vpop.f32.mrf.mxu1 }
 0x8a4   : > { %v2285_v48 = vadd.f32 %v2584_v32, %v2284_v47 }
 0x8a5   : > { %v2748_v49 = vpop.f32.mrf.mxu1 }
 0x8a6   : > { %v2291_v50 = vmul.f32 0.70710677, %v2285_v48  ;;  %v2290_v15 = vmul.f32 0.5, %v2285_v48 }
 0x8a7   : > { %v2287_v52 = vpop.f32.mrf.mxu1 }
 0x8a8   : > { %2905 = verf.f32 %v2291_v50 }
 0x8a9   : > { %v2749_v53 = vpop.f32.mrf.mxu1 }
 0x8b5   : > { %v2906_v55 = vpop.eup %2905 }
 0x8b6   : > { %v2293_v56 = vadd.f32 1.0, %v2906_v55 }
 0x8b8   : > { %v2294_v58 = vmul.f32 %v2293_v56, %v2290_v15 }
 0x8ba   : > { %v2295_v60 = vpack.c.bf16 %v2294_v58, %v2294_v58 }
 0x8bc   : > { %2767 = vmatmul.mubr.bf16.vlgmr.msra.gmra.mxu0 %v2295_v60 }
 0x97c   : > { %v2401_v63 = vpop.f32.mrf.mxu0 }
 0x97d   : > { %v2402_v1 = vadd.f32 %v2588_v62, %v2401_v63 }
 0x97e   : > { %v2768_v2 = vpop.f32.mrf.mxu0 }
 0x97f   : > { %v2407_v3 = vadd.f32 %v2402_v1, %v3585_v42 }
 0x980   : > { %v2404_v4 = vpop.f32.mrf.mxu0 }
 0x981   : > { %2408 = vst.msk [vmem:[%s656_s23] sm:$0xff] %vm683_vm0, %v2407_v3 }
 0x982   : > { %v2769_v61 = vpop.f32.mrf.mxu0 }
 0x983   : > { %2973 = shalt.err (!%p2970_p9)
}
 0x984   : > { %s2974_s24 = scalar_lea.hbm %s3642_s1, 128  ;;  %s2978_s23 = scalar_lea.hbm %s3707_s18, 256 }
 0x985   : > { %p2975_p12 = scmp.ne.s32.totalorder %s3642_s1, %s2974_s24  ;;  %p2979_p5 = scmp.lt.s32.totalorder %s3642_s1, %s3707_s18 }
 0x986   : > { %p2980_p3 = scmp.lt.s32.totalorder %s2978_s23, %s2974_s24 }
 0x987   : > { %p2976_p1 = pnand %p2975_p12, %p3734_p10 }
 0x988   : > { %p2981_p4 = por %p2980_p3, %p2979_p5 }
 0x989   : > { %p2977_p2 = pneg %p2976_p1 }
 0x98b   : > { %p2982_p8 = pnand %p2981_p4, %p2977_p2 }
 0x98d   : > { %2985 = shalt.err (!%p2982_p8)
}
 0x98e   : > { %2778 = dma.vmem_to_hbm [thread:$0]  (%p3734_p10), %s3644_s20, 128, %s3642_s1, %s2410_s30  }
 0x98f PF: > { %s3735_s29 = sld [smem:[#allocation18_spill]] }
 0x990   : > { %s3736_s0 = sld [smem:[#allocation15_spill]] }
 0x991   : > { %s3737_s21 = sld [smem:[#allocation20_spill]] }
 0x995   : > { %p2795_p11 = scmp.ge.s32.totalorder %s3735_s29, 2 }
 0x996   : > { %s2436_s25 = sand.u32 1, %s3736_s0  }
 0x997   : > { %p3738_p13 = scmp.ne.s32.totalorder %s3737_s21, 0  ;;  %s2437_s19 = scalar_lea.sflag [#allocation8], %s2436_s25 }
 0x999   : > { %p2788_p0 = pnand %p2795_p11, %p3738_p13 }
 0x99b   : > { %p2789_p6 = pneg %p2788_p0 }
 0x99d   : > { %3019 = dma.done.wait (%p2789_p6), %s2437_s19, 128  }
 0x99e   : > { %3021 = vsyncadd (%p2789_p6), %s2437_s19, 4294967168  ;;  %s33_s19 = sadd.s32 1, %s3735_s29   ;;  %s3739_s2 = sld [smem:[#allocation16_spill]] }
 0x99f   : > { %p30_p7 = scmp.ge.s32.totalorder %s33_s19, 4   ;;  %s3740_s29 = sld [smem:[#allocation21_spill]] }
 0x9a0   : > { %s3741_s30 = sld [smem:[#allocation17_spill]]  ;;  %s3743_s27 = smov %s3028_s28 }
 0x9a1   : > { %s3742_s0 = sld [smem:[#allocation19_spill]]  ;;  %32 = sbr.rel (!%p30_p7) target bundleno = 10 (0xa), region = 151 }
 0x9a4   : > { %s3744_s28 = smov %s3739_s2 }
 0x9a6   :  { %2442 = vsyncpa [#allocation7], 1 }
 0x9a7   :  { %2444 = vsyncpa [#allocation7 + $0x1], 1 }
 0x9a8   :  { %2445 = vsyncpa [#allocation10], 1 }
 0x9a9   :  { %2446 = vsyncpa [#allocation8], 1 }
 0x9aa   :  { %2448 = vsyncpa [#allocation8 + $0x1], 1 }

</bundles_post_ra>
